<compile_context>
chip_gen: v7x
topology: tpu7x:2x2x1
jax: 0.10.0
libtpu: 0.0.40
codegen_flags: <defaults>
</compile_context>

<pallas_src>
import functools

import jax
import jax.numpy as jnp
from jax import lax
from jax.experimental import pallas as pl
from jax.experimental.pallas import tpu as pltpu


# Set to jnp.bfloat16 to use the bf16 MXU path recommended for v6e/v7x (the
# accumulation, biases and ReLUs stay in f32).  Default f32 keeps numerics
# identical to the PyTorch module.
COMPUTE_DTYPE = jnp.float32

CONV_PAD = 2  # fixed by the module: nn.Conv2d(..., padding=2)


def _round_up(x, m):
    return (x + m - 1) // m * m


# ---------------------------------------------------------------------------
# Fused kernel: conv(5x5,pad=2)+ReLU -> flatten -> linear+ReLU -> linear
# One grid step == one sample.
# ---------------------------------------------------------------------------
def _fused_cnn_kernel(x_ref, w0_ref, b0_ref, w1_ref, b1_ref, w2_ref, b2_ref, o_ref,
                      *, ksize, wp, span, out_c, compute_dtype):
    # x_ref : (1, Cp, FLAT)        row-flattened, zero-padded sample
    # w0_ref: (K*K, out_c, Cp)     conv taps, [kh*K+kw, oc, c]
    # b0_ref: (out_c, 1)           f32
    # w1_ref: (out_c, Ho*Wp, hid)  flatten-order + pad-column masking folded in
    # b1_ref: (1, hid)  f32        w2_ref: (hid, n_out)   b2_ref: (1, n_out) f32
    xv = x_ref[0]                  # (Cp, FLAT) -- stays in vregs
    w0v = w0_ref[...]              # (K*K, out_c, Cp)

    # ---- Conv2d(padding=2): 25 shifted-window matmuls, f32 accumulation ----
    acc = jnp.zeros((out_c, span), jnp.float32)
    for kh in range(ksize):
        for kw in range(ksize):
            off = kh * wp + kw                      # static lane offset
            win = xv[:, off:off + span]             # (Cp, span) contiguous slice
            acc = acc + jnp.dot(w0v[kh * ksize + kw], win,
                                preferred_element_type=jnp.float32)
    convp = jnp.maximum(acc + b0_ref[...], 0.0)     # bias + ReLU in f32, (out_c, span)
    convp = convp.astype(compute_dtype)

    # ---- Flatten + Linear(hidden): contraction folded into permuted weight ----
    y1 = b1_ref[...]                                # (1, hid) f32
    for oc in range(out_c):
        y1 = y1 + jnp.dot(convp[oc:oc + 1, :], w1_ref[oc],
                          preferred_element_type=jnp.float32)
    y1 = jnp.maximum(y1, 0.0).astype(compute_dtype)

    # ---- Final Linear (no ReLU) ----
    out = jnp.dot(y1, w2_ref[...], preferred_element_type=jnp.float32) + b2_ref[...]
    o_ref[...] = out[None].astype(o_ref.dtype)      # (1, 1, n_out)


def forward(x, kparams):
    """Fused ConvolutionalNetwork forward.  x: (N, C, H, W) float32."""
    w0k, b0c, w1p, b1r, w2t, b2r = kparams
    N, C, H, W = x.shape
    KK, out_c, Cp = w0k.shape
    K = int(round(KK ** 0.5))
    Hp, Wp = H + 2 * CONV_PAD, W + 2 * CONV_PAD
    Ho, Wo = Hp - K + 1, Wp - K + 1
    span = Ho * Wp                                   # conv output row-stride layout
    assert w1p.shape[1] == span
    hidden = w1p.shape[2]
    n_out = w2t.shape[1]
    cdt = w0k.dtype

    # Flat length: must cover the largest tap offset + span; round to 128 lanes.
    flat = _round_up((K - 1) * Wp + (K - 1) + span, 128)

    # Cheap input prep (2 pads + reshape on a tiny tensor): channel-pad to 8,
    # spatial-pad by 2, row-flatten, lane-pad to `flat`.
    xp = jnp.pad(x.astype(cdt),
                 ((0, 0), (0, Cp - C), (CONV_PAD, CONV_PAD), (CONV_PAD, CONV_PAD)))
    xp = xp.reshape(N, Cp, Hp * Wp)
    xp = jnp.pad(xp, ((0, 0), (0, 0), (0, flat - Hp * Wp)))

    itemsize = jnp.dtype(cdt).itemsize
    flops = 2 * N * (KK * out_c * Cp * span + out_c * span * hidden + hidden * n_out)
    bytes_accessed = (N * Cp * flat * itemsize
                      + (w0k.size + w1p.size + w2t.size) * itemsize
                      + (b0c.size + b1r.size + b2r.size) * 4
                      + N * n_out * 4)

    kernel = functools.partial(_fused_cnn_kernel, ksize=K, wp=Wp, span=span,
                               out_c=out_c, compute_dtype=cdt)

    res = pl.pallas_call(
        kernel,
        out_shape=jax.ShapeDtypeStruct((N, 1, n_out), jnp.float32),
        grid=(N,),
        in_specs=[
            pl.BlockSpec((1, Cp, flat), lambda n: (n, 0, 0)),      # per-sample input
            pl.BlockSpec((KK, out_c, Cp), lambda n: (0, 0, 0)),    # conv taps (resident)
            pl.BlockSpec((out_c, 1), lambda n: (0, 0)),            # conv bias
            pl.BlockSpec((out_c, span, hidden), lambda n: (0, 0, 0)),  # linear1 W (resident)
            pl.BlockSpec((1, hidden), lambda n: (0, 0)),           # linear1 b
            pl.BlockSpec((hidden, n_out), lambda n: (0, 0)),       # linear2 W
            pl.BlockSpec((1, n_out), lambda n: (0, 0)),            # linear2 b
        ],
        out_specs=pl.BlockSpec((1, 1, n_out), lambda n: (n, 0, 0)),
        compiler_params=pltpu.CompilerParams(dimension_semantics=("parallel",)),
        cost_estimate=pl.CostEstimate(flops=flops, transcendentals=0,
                                      bytes_accessed=bytes_accessed),
    )(xp, w0k, b0c, w1p, b1r, w2t, b2r)
    return res.reshape(N, n_out)


# ---------------------------------------------------------------------------
# One-time weight preprocessing: fold flatten order / padded-stride masking /
# transposes into the stored weights (zero runtime cost).
# ---------------------------------------------------------------------------
def prepare_kernel_params(params, H, W, compute_dtype=COMPUTE_DTYPE):
    (k0, w0, b0), (k1, w1, b1), (k2, w2, b2) = params
    assert k0 == "conv" and k1 == "linear" and k2 == "linear"
    out_c, in_c, K, _ = w0.shape
    Cp = _round_up(in_c, 8)
    Hp, Wp = H + 2 * CONV_PAD, W + 2 * CONV_PAD
    Ho, Wo = Hp - K + 1, Wp - K + 1
    hidden = w1.shape[0]
    assert w1.shape[1] == out_c * Ho * Wo, "first Linear in_size must equal out_c*Ho*Wo"

    # Conv taps: (K*K, out_c, Cp), channels zero-padded to Cp.
    w0p = jnp.pad(w0, ((0, 0), (0, Cp - in_c), (0, 0), (0, 0)))
    w0k = jnp.transpose(w0p, (2, 3, 0, 1)).reshape(K * K, out_c, Cp).astype(compute_dtype)
    b0c = b0.reshape(out_c, 1).astype(jnp.float32)

    # Linear1: PyTorch columns are (c, h, w) of the NCHW conv output.  The kernel's
    # conv layout is (c, h*Wp + w) with garbage columns at w >= Wo -> zero-pad those.
    w1r = w1.reshape(hidden, out_c, Ho, Wo)
    w1r = jnp.pad(w1r, ((0, 0), (0, 0), (0, 0), (0, Wp - Wo)))
    w1p = jnp.transpose(w1r.reshape(hidden, out_c, Ho * Wp), (1, 2, 0)).astype(compute_dtype)
    b1r = b1.reshape(1, hidden).astype(jnp.float32)

    w2t = jnp.transpose(w2).astype(compute_dtype)
    b2r = b2.reshape(1, w2.shape[0]).astype(jnp.float32)
    return (w0k, b0c, w1p, b1r, w2t, b2r)


# ---------------------------------------------------------------------------
# Deterministic parameter init (same shapes / fan-in scaling as nn.Conv2d /
# nn.Linear defaults).  Synthetic — no checkpoint loading.
# ---------------------------------------------------------------------------
def init_params(architecture, key):
    params = []
    for layer in architecture:
        if len(layer) == 3:
            in_c, out_c, k = layer
            bound = 1.0 / float(in_c * k * k) ** 0.5
            key, kw_, kb_ = jax.random.split(key, 3)
            w = jax.random.uniform(kw_, (out_c, in_c, k, k), jnp.float32, -bound, bound)
            b = jax.random.uniform(kb_, (out_c,), jnp.float32, -bound, bound)
            params.append(("conv", w, b))
        else:
            in_f, out_f = layer[0], layer[1]
            bound = 1.0 / float(in_f) ** 0.5
            key, kw_, kb_ = jax.random.split(key, 3)
            w = jax.random.uniform(kw_, (out_f, in_f), jnp.float32, -bound, bound)
            b = jax.random.uniform(kb_, (out_f,), jnp.float32, -bound, bound)
            params.append(("linear", w, b))
    return params


# Pure-JAX reference mirroring the PyTorch module (for the correctness check).
def reference_forward(params, x):
    (_, w0, b0), (_, w1, b1), (_, w2, b2) = params
    y = lax.conv_general_dilated(
        x, w0, window_strides=(1, 1),
        padding=((CONV_PAD, CONV_PAD), (CONV_PAD, CONV_PAD)),
        dimension_numbers=("NCHW", "OIHW", "NCHW"),
        precision=lax.Precision.HIGHEST)
    y = jnp.maximum(y + b0[None, :, None, None], 0.0)
    y = y.reshape(y.shape[0], -1)
    y = jnp.maximum(jnp.dot(y, w1.T, precision=lax.Precision.HIGHEST) + b1[None, :], 0.0)
    y = jnp.dot(y, w2.T, precision=lax.Precision.HIGHEST) + b2[None, :]
    return y


if __name__ == "__main__":
    key = jax.random.PRNGKey(0)
    kx, kp = jax.random.split(key)

    N, C, H, W = 2, 3, 16, 16
    architecture = [[3, 8, 5], [8 * H * W, 32], [32, 10]]

    x = jax.random.normal(kx, (N, C, H, W), dtype=jnp.float32)
    params = init_params(architecture, kp)
    kparams = prepare_kernel_params(params, H, W)

    fwd = jax.jit(forward)
    out = jax.block_until_ready(fwd(x, kparams))
    assert out.shape == (N, 10) and out.dtype == jnp.float32

    ref = reference_forward(params, x)
    tol = 1e-2 if COMPUTE_DTYPE == jnp.float32 else 1e-1
    assert jnp.allclose(out, ref, atol=tol, rtol=tol), (
        f"mismatch: max abs err = {float(jnp.max(jnp.abs(out - ref)))}")

    print("KERNEL_OK")
</pallas_src>

<mosaic_0001>
module attributes {stable_mosaic.version = 11 : i64} {
  func.func @_fused_cnn_kernel(%arg0: i32, %arg1: memref<1x8x512xf32, #tpu.memory_space<vmem>>, %arg2: memref<25x8x8xf32, #tpu.memory_space<vmem>>, %arg3: memref<8x1xf32, #tpu.memory_space<vmem>>, %arg4: memref<8x320x32xf32, #tpu.memory_space<vmem>>, %arg5: memref<1x32xf32, #tpu.memory_space<vmem>>, %arg6: memref<32x10xf32, #tpu.memory_space<vmem>>, %arg7: memref<1x10xf32, #tpu.memory_space<vmem>>, %arg8: memref<1x1x10xf32, #tpu.memory_space<vmem>>) attributes {dimension_semantics = [#tpu.dimension_semantics<parallel>], iteration_bounds = array<i64: 2>, scalar_prefetch = 0 : i64, scratch_operands = 0 : i64, tpu.core_type = #tpu.core_type<tc>, window_params = [{transform_indices = @transform_0, window_bounds = array<i64: 1, 8, 512>}, {pipeline_mode = #tpu.pipeline_mode<synchronous>, transform_indices = @transform_1, window_bounds = array<i64: 25, 8, 8>}, {pipeline_mode = #tpu.pipeline_mode<synchronous>, transform_indices = @transform_2, window_bounds = array<i64: 8, 1>}, {pipeline_mode = #tpu.pipeline_mode<synchronous>, transform_indices = @transform_3, window_bounds = array<i64: 8, 320, 32>}, {pipeline_mode = #tpu.pipeline_mode<synchronous>, transform_indices = @transform_4, window_bounds = array<i64: 1, 32>}, {pipeline_mode = #tpu.pipeline_mode<synchronous>, transform_indices = @transform_5, window_bounds = array<i64: 32, 10>}, {pipeline_mode = #tpu.pipeline_mode<synchronous>, transform_indices = @transform_6, window_bounds = array<i64: 1, 10>}, {transform_indices = @transform_7, window_bounds = array<i64: 1, 1, 10>}]} {
    %c0 = arith.constant 0 : index
    %c0_0 = arith.constant 0 : index
    %c0_1 = arith.constant 0 : index
    %0 = vector.load %arg1[%c0, %c0_0, %c0_1] : memref<1x8x512xf32, #tpu.memory_space<vmem>>, vector<1x8x512xf32>
    %1 = vector.shape_cast %0 : vector<1x8x512xf32> to vector<8x512xf32>
    %c0_2 = arith.constant 0 : index
    %c0_3 = arith.constant 0 : index
    %c0_4 = arith.constant 0 : index
    %2 = vector.load %arg2[%c0_2, %c0_3, %c0_4] : memref<25x8x8xf32, #tpu.memory_space<vmem>>, vector<25x8x8xf32>
    %cst = arith.constant 0.000000e+00 : f32
    %3 = vector.broadcast %cst : f32 to vector<8x320xf32>
    %4 = vector.extract_strided_slice %1 {offsets = [0, 0], sizes = [8, 320], strides = [1, 1]} : vector<8x512xf32> to vector<8x320xf32>
    %5 = vector.extract_strided_slice %2 {offsets = [0, 0, 0], sizes = [1, 8, 8], strides = [1, 1, 1]} : vector<25x8x8xf32> to vector<1x8x8xf32>
    %6 = vector.shape_cast %5 : vector<1x8x8xf32> to vector<8x8xf32>
    %cst_5 = arith.constant dense<0.000000e+00> : vector<8x320xf32>
    %7 = tpu.matmul %6, %4, %cst_5 {dimension_numbers = #tpu.dot_dimension_numbers<[1], [0], [0], [1], [0, 0, 1, 1], [], []>} : vector<8x8xf32>, vector<8x320xf32>, vector<8x320xf32> -> vector<8x320xf32>
    %8 = arith.addf %3, %7 : vector<8x320xf32>
    %9 = vector.extract_strided_slice %1 {offsets = [0, 1], sizes = [8, 320], strides = [1, 1]} : vector<8x512xf32> to vector<8x320xf32>
    %10 = vector.extract_strided_slice %2 {offsets = [1, 0, 0], sizes = [1, 8, 8], strides = [1, 1, 1]} : vector<25x8x8xf32> to vector<1x8x8xf32>
    %11 = vector.shape_cast %10 : vector<1x8x8xf32> to vector<8x8xf32>
    %cst_6 = arith.constant dense<0.000000e+00> : vector<8x320xf32>
    %12 = tpu.matmul %11, %9, %cst_6 {dimension_numbers = #tpu.dot_dimension_numbers<[1], [0], [0], [1], [0, 0, 1, 1], [], []>} : vector<8x8xf32>, vector<8x320xf32>, vector<8x320xf32> -> vector<8x320xf32>
    %13 = arith.addf %8, %12 : vector<8x320xf32>
    %14 = vector.extract_strided_slice %1 {offsets = [0, 2], sizes = [8, 320], strides = [1, 1]} : vector<8x512xf32> to vector<8x320xf32>
    %15 = vector.extract_strided_slice %2 {offsets = [2, 0, 0], sizes = [1, 8, 8], strides = [1, 1, 1]} : vector<25x8x8xf32> to vector<1x8x8xf32>
    %16 = vector.shape_cast %15 : vector<1x8x8xf32> to vector<8x8xf32>
    %cst_7 = arith.constant dense<0.000000e+00> : vector<8x320xf32>
    %17 = tpu.matmul %16, %14, %cst_7 {dimension_numbers = #tpu.dot_dimension_numbers<[1], [0], [0], [1], [0, 0, 1, 1], [], []>} : vector<8x8xf32>, vector<8x320xf32>, vector<8x320xf32> -> vector<8x320xf32>
    %18 = arith.addf %13, %17 : vector<8x320xf32>
    %19 = vector.extract_strided_slice %1 {offsets = [0, 3], sizes = [8, 320], strides = [1, 1]} : vector<8x512xf32> to vector<8x320xf32>
    %20 = vector.extract_strided_slice %2 {offsets = [3, 0, 0], sizes = [1, 8, 8], strides = [1, 1, 1]} : vector<25x8x8xf32> to vector<1x8x8xf32>
    %21 = vector.shape_cast %20 : vector<1x8x8xf32> to vector<8x8xf32>
    %cst_8 = arith.constant dense<0.000000e+00> : vector<8x320xf32>
    %22 = tpu.matmul %21, %19, %cst_8 {dimension_numbers = #tpu.dot_dimension_numbers<[1], [0], [0], [1], [0, 0, 1, 1], [], []>} : vector<8x8xf32>, vector<8x320xf32>, vector<8x320xf32> -> vector<8x320xf32>
    %23 = arith.addf %18, %22 : vector<8x320xf32>
    %24 = vector.extract_strided_slice %1 {offsets = [0, 4], sizes = [8, 320], strides = [1, 1]} : vector<8x512xf32> to vector<8x320xf32>
    %25 = vector.extract_strided_slice %2 {offsets = [4, 0, 0], sizes = [1, 8, 8], strides = [1, 1, 1]} : vector<25x8x8xf32> to vector<1x8x8xf32>
    %26 = vector.shape_cast %25 : vector<1x8x8xf32> to vector<8x8xf32>
    %cst_9 = arith.constant dense<0.000000e+00> : vector<8x320xf32>
    %27 = tpu.matmul %26, %24, %cst_9 {dimension_numbers = #tpu.dot_dimension_numbers<[1], [0], [0], [1], [0, 0, 1, 1], [], []>} : vector<8x8xf32>, vector<8x320xf32>, vector<8x320xf32> -> vector<8x320xf32>
    %28 = arith.addf %23, %27 : vector<8x320xf32>
    %29 = vector.extract_strided_slice %1 {offsets = [0, 20], sizes = [8, 320], strides = [1, 1]} : vector<8x512xf32> to vector<8x320xf32>
    %30 = vector.extract_strided_slice %2 {offsets = [5, 0, 0], sizes = [1, 8, 8], strides = [1, 1, 1]} : vector<25x8x8xf32> to vector<1x8x8xf32>
    %31 = vector.shape_cast %30 : vector<1x8x8xf32> to vector<8x8xf32>
    %cst_10 = arith.constant dense<0.000000e+00> : vector<8x320xf32>
    %32 = tpu.matmul %31, %29, %cst_10 {dimension_numbers = #tpu.dot_dimension_numbers<[1], [0], [0], [1], [0, 0, 1, 1], [], []>} : vector<8x8xf32>, vector<8x320xf32>, vector<8x320xf32> -> vector<8x320xf32>
    %33 = arith.addf %28, %32 : vector<8x320xf32>
    %34 = vector.extract_strided_slice %1 {offsets = [0, 21], sizes = [8, 320], strides = [1, 1]} : vector<8x512xf32> to vector<8x320xf32>
    %35 = vector.extract_strided_slice %2 {offsets = [6, 0, 0], sizes = [1, 8, 8], strides = [1, 1, 1]} : vector<25x8x8xf32> to vector<1x8x8xf32>
    %36 = vector.shape_cast %35 : vector<1x8x8xf32> to vector<8x8xf32>
    %cst_11 = arith.constant dense<0.000000e+00> : vector<8x320xf32>
    %37 = tpu.matmul %36, %34, %cst_11 {dimension_numbers = #tpu.dot_dimension_numbers<[1], [0], [0], [1], [0, 0, 1, 1], [], []>} : vector<8x8xf32>, vector<8x320xf32>, vector<8x320xf32> -> vector<8x320xf32>
    %38 = arith.addf %33, %37 : vector<8x320xf32>
    %39 = vector.extract_strided_slice %1 {offsets = [0, 22], sizes = [8, 320], strides = [1, 1]} : vector<8x512xf32> to vector<8x320xf32>
    %40 = vector.extract_strided_slice %2 {offsets = [7, 0, 0], sizes = [1, 8, 8], strides = [1, 1, 1]} : vector<25x8x8xf32> to vector<1x8x8xf32>
    %41 = vector.shape_cast %40 : vector<1x8x8xf32> to vector<8x8xf32>
    %cst_12 = arith.constant dense<0.000000e+00> : vector<8x320xf32>
    %42 = tpu.matmul %41, %39, %cst_12 {dimension_numbers = #tpu.dot_dimension_numbers<[1], [0], [0], [1], [0, 0, 1, 1], [], []>} : vector<8x8xf32>, vector<8x320xf32>, vector<8x320xf32> -> vector<8x320xf32>
    %43 = arith.addf %38, %42 : vector<8x320xf32>
    %44 = vector.extract_strided_slice %1 {offsets = [0, 23], sizes = [8, 320], strides = [1, 1]} : vector<8x512xf32> to vector<8x320xf32>
    %45 = vector.extract_strided_slice %2 {offsets = [8, 0, 0], sizes = [1, 8, 8], strides = [1, 1, 1]} : vector<25x8x8xf32> to vector<1x8x8xf32>
    %46 = vector.shape_cast %45 : vector<1x8x8xf32> to vector<8x8xf32>
    %cst_13 = arith.constant dense<0.000000e+00> : vector<8x320xf32>
    %47 = tpu.matmul %46, %44, %cst_13 {dimension_numbers = #tpu.dot_dimension_numbers<[1], [0], [0], [1], [0, 0, 1, 1], [], []>} : vector<8x8xf32>, vector<8x320xf32>, vector<8x320xf32> -> vector<8x320xf32>
    %48 = arith.addf %43, %47 : vector<8x320xf32>
    %49 = vector.extract_strided_slice %1 {offsets = [0, 24], sizes = [8, 320], strides = [1, 1]} : vector<8x512xf32> to vector<8x320xf32>
    %50 = vector.extract_strided_slice %2 {offsets = [9, 0, 0], sizes = [1, 8, 8], strides = [1, 1, 1]} : vector<25x8x8xf32> to vector<1x8x8xf32>
    %51 = vector.shape_cast %50 : vector<1x8x8xf32> to vector<8x8xf32>
    %cst_14 = arith.constant dense<0.000000e+00> : vector<8x320xf32>
    %52 = tpu.matmul %51, %49, %cst_14 {dimension_numbers = #tpu.dot_dimension_numbers<[1], [0], [0], [1], [0, 0, 1, 1], [], []>} : vector<8x8xf32>, vector<8x320xf32>, vector<8x320xf32> -> vector<8x320xf32>
    %53 = arith.addf %48, %52 : vector<8x320xf32>
    %54 = vector.extract_strided_slice %1 {offsets = [0, 40], sizes = [8, 320], strides = [1, 1]} : vector<8x512xf32> to vector<8x320xf32>
    %55 = vector.extract_strided_slice %2 {offsets = [10, 0, 0], sizes = [1, 8, 8], strides = [1, 1, 1]} : vector<25x8x8xf32> to vector<1x8x8xf32>
    %56 = vector.shape_cast %55 : vector<1x8x8xf32> to vector<8x8xf32>
    %cst_15 = arith.constant dense<0.000000e+00> : vector<8x320xf32>
    %57 = tpu.matmul %56, %54, %cst_15 {dimension_numbers = #tpu.dot_dimension_numbers<[1], [0], [0], [1], [0, 0, 1, 1], [], []>} : vector<8x8xf32>, vector<8x320xf32>, vector<8x320xf32> -> vector<8x320xf32>
    %58 = arith.addf %53, %57 : vector<8x320xf32>
    %59 = vector.extract_strided_slice %1 {offsets = [0, 41], sizes = [8, 320], strides = [1, 1]} : vector<8x512xf32> to vector<8x320xf32>
    %60 = vector.extract_strided_slice %2 {offsets = [11, 0, 0], sizes = [1, 8, 8], strides = [1, 1, 1]} : vector<25x8x8xf32> to vector<1x8x8xf32>
    %61 = vector.shape_cast %60 : vector<1x8x8xf32> to vector<8x8xf32>
    %cst_16 = arith.constant dense<0.000000e+00> : vector<8x320xf32>
    %62 = tpu.matmul %61, %59, %cst_16 {dimension_numbers = #tpu.dot_dimension_numbers<[1], [0], [0], [1], [0, 0, 1, 1], [], []>} : vector<8x8xf32>, vector<8x320xf32>, vector<8x320xf32> -> vector<8x320xf32>
    %63 = arith.addf %58, %62 : vector<8x320xf32>
    %64 = vector.extract_strided_slice %1 {offsets = [0, 42], sizes = [8, 320], strides = [1, 1]} : vector<8x512xf32> to vector<8x320xf32>
    %65 = vector.extract_strided_slice %2 {offsets = [12, 0, 0], sizes = [1, 8, 8], strides = [1, 1, 1]} : vector<25x8x8xf32> to vector<1x8x8xf32>
    %66 = vector.shape_cast %65 : vector<1x8x8xf32> to vector<8x8xf32>
    %cst_17 = arith.constant dense<0.000000e+00> : vector<8x320xf32>
    %67 = tpu.matmul %66, %64, %cst_17 {dimension_numbers = #tpu.dot_dimension_numbers<[1], [0], [0], [1], [0, 0, 1, 1], [], []>} : vector<8x8xf32>, vector<8x320xf32>, vector<8x320xf32> -> vector<8x320xf32>
    %68 = arith.addf %63, %67 : vector<8x320xf32>
    %69 = vector.extract_strided_slice %1 {offsets = [0, 43], sizes = [8, 320], strides = [1, 1]} : vector<8x512xf32> to vector<8x320xf32>
    %70 = vector.extract_strided_slice %2 {offsets = [13, 0, 0], sizes = [1, 8, 8], strides = [1, 1, 1]} : vector<25x8x8xf32> to vector<1x8x8xf32>
    %71 = vector.shape_cast %70 : vector<1x8x8xf32> to vector<8x8xf32>
    %cst_18 = arith.constant dense<0.000000e+00> : vector<8x320xf32>
    %72 = tpu.matmul %71, %69, %cst_18 {dimension_numbers = #tpu.dot_dimension_numbers<[1], [0], [0], [1], [0, 0, 1, 1], [], []>} : vector<8x8xf32>, vector<8x320xf32>, vector<8x320xf32> -> vector<8x320xf32>
    %73 = arith.addf %68, %72 : vector<8x320xf32>
    %74 = vector.extract_strided_slice %1 {offsets = [0, 44], sizes = [8, 320], strides = [1, 1]} : vector<8x512xf32> to vector<8x320xf32>
    %75 = vector.extract_strided_slice %2 {offsets = [14, 0, 0], sizes = [1, 8, 8], strides = [1, 1, 1]} : vector<25x8x8xf32> to vector<1x8x8xf32>
    %76 = vector.shape_cast %75 : vector<1x8x8xf32> to vector<8x8xf32>
    %cst_19 = arith.constant dense<0.000000e+00> : vector<8x320xf32>
    %77 = tpu.matmul %76, %74, %cst_19 {dimension_numbers = #tpu.dot_dimension_numbers<[1], [0], [0], [1], [0, 0, 1, 1], [], []>} : vector<8x8xf32>, vector<8x320xf32>, vector<8x320xf32> -> vector<8x320xf32>
    %78 = arith.addf %73, %77 : vector<8x320xf32>
    %79 = vector.extract_strided_slice %1 {offsets = [0, 60], sizes = [8, 320], strides = [1, 1]} : vector<8x512xf32> to vector<8x320xf32>
    %80 = vector.extract_strided_slice %2 {offsets = [15, 0, 0], sizes = [1, 8, 8], strides = [1, 1, 1]} : vector<25x8x8xf32> to vector<1x8x8xf32>
    %81 = vector.shape_cast %80 : vector<1x8x8xf32> to vector<8x8xf32>
    %cst_20 = arith.constant dense<0.000000e+00> : vector<8x320xf32>
    %82 = tpu.matmul %81, %79, %cst_20 {dimension_numbers = #tpu.dot_dimension_numbers<[1], [0], [0], [1], [0, 0, 1, 1], [], []>} : vector<8x8xf32>, vector<8x320xf32>, vector<8x320xf32> -> vector<8x320xf32>
    %83 = arith.addf %78, %82 : vector<8x320xf32>
    %84 = vector.extract_strided_slice %1 {offsets = [0, 61], sizes = [8, 320], strides = [1, 1]} : vector<8x512xf32> to vector<8x320xf32>
    %85 = vector.extract_strided_slice %2 {offsets = [16, 0, 0], sizes = [1, 8, 8], strides = [1, 1, 1]} : vector<25x8x8xf32> to vector<1x8x8xf32>
    %86 = vector.shape_cast %85 : vector<1x8x8xf32> to vector<8x8xf32>
    %cst_21 = arith.constant dense<0.000000e+00> : vector<8x320xf32>
    %87 = tpu.matmul %86, %84, %cst_21 {dimension_numbers = #tpu.dot_dimension_numbers<[1], [0], [0], [1], [0, 0, 1, 1], [], []>} : vector<8x8xf32>, vector<8x320xf32>, vector<8x320xf32> -> vector<8x320xf32>
    %88 = arith.addf %83, %87 : vector<8x320xf32>
    %89 = vector.extract_strided_slice %1 {offsets = [0, 62], sizes = [8, 320], strides = [1, 1]} : vector<8x512xf32> to vector<8x320xf32>
    %90 = vector.extract_strided_slice %2 {offsets = [17, 0, 0], sizes = [1, 8, 8], strides = [1, 1, 1]} : vector<25x8x8xf32> to vector<1x8x8xf32>
    %91 = vector.shape_cast %90 : vector<1x8x8xf32> to vector<8x8xf32>
    %cst_22 = arith.constant dense<0.000000e+00> : vector<8x320xf32>
    %92 = tpu.matmul %91, %89, %cst_22 {dimension_numbers = #tpu.dot_dimension_numbers<[1], [0], [0], [1], [0, 0, 1, 1], [], []>} : vector<8x8xf32>, vector<8x320xf32>, vector<8x320xf32> -> vector<8x320xf32>
    %93 = arith.addf %88, %92 : vector<8x320xf32>
    %94 = vector.extract_strided_slice %1 {offsets = [0, 63], sizes = [8, 320], strides = [1, 1]} : vector<8x512xf32> to vector<8x320xf32>
    %95 = vector.extract_strided_slice %2 {offsets = [18, 0, 0], sizes = [1, 8, 8], strides = [1, 1, 1]} : vector<25x8x8xf32> to vector<1x8x8xf32>
    %96 = vector.shape_cast %95 : vector<1x8x8xf32> to vector<8x8xf32>
    %cst_23 = arith.constant dense<0.000000e+00> : vector<8x320xf32>
    %97 = tpu.matmul %96, %94, %cst_23 {dimension_numbers = #tpu.dot_dimension_numbers<[1], [0], [0], [1], [0, 0, 1, 1], [], []>} : vector<8x8xf32>, vector<8x320xf32>, vector<8x320xf32> -> vector<8x320xf32>
    %98 = arith.addf %93, %97 : vector<8x320xf32>
    %99 = vector.extract_strided_slice %1 {offsets = [0, 64], sizes = [8, 320], strides = [1, 1]} : vector<8x512xf32> to vector<8x320xf32>
    %100 = vector.extract_strided_slice %2 {offsets = [19, 0, 0], sizes = [1, 8, 8], strides = [1, 1, 1]} : vector<25x8x8xf32> to vector<1x8x8xf32>
    %101 = vector.shape_cast %100 : vector<1x8x8xf32> to vector<8x8xf32>
    %cst_24 = arith.constant dense<0.000000e+00> : vector<8x320xf32>
    %102 = tpu.matmul %101, %99, %cst_24 {dimension_numbers = #tpu.dot_dimension_numbers<[1], [0], [0], [1], [0, 0, 1, 1], [], []>} : vector<8x8xf32>, vector<8x320xf32>, vector<8x320xf32> -> vector<8x320xf32>
    %103 = arith.addf %98, %102 : vector<8x320xf32>
    %104 = vector.extract_strided_slice %1 {offsets = [0, 80], sizes = [8, 320], strides = [1, 1]} : vector<8x512xf32> to vector<8x320xf32>
    %105 = vector.extract_strided_slice %2 {offsets = [20, 0, 0], sizes = [1, 8, 8], strides = [1, 1, 1]} : vector<25x8x8xf32> to vector<1x8x8xf32>
    %106 = vector.shape_cast %105 : vector<1x8x8xf32> to vector<8x8xf32>
    %cst_25 = arith.constant dense<0.000000e+00> : vector<8x320xf32>
    %107 = tpu.matmul %106, %104, %cst_25 {dimension_numbers = #tpu.dot_dimension_numbers<[1], [0], [0], [1], [0, 0, 1, 1], [], []>} : vector<8x8xf32>, vector<8x320xf32>, vector<8x320xf32> -> vector<8x320xf32>
    %108 = arith.addf %103, %107 : vector<8x320xf32>
    %109 = vector.extract_strided_slice %1 {offsets = [0, 81], sizes = [8, 320], strides = [1, 1]} : vector<8x512xf32> to vector<8x320xf32>
    %110 = vector.extract_strided_slice %2 {offsets = [21, 0, 0], sizes = [1, 8, 8], strides = [1, 1, 1]} : vector<25x8x8xf32> to vector<1x8x8xf32>
    %111 = vector.shape_cast %110 : vector<1x8x8xf32> to vector<8x8xf32>
    %cst_26 = arith.constant dense<0.000000e+00> : vector<8x320xf32>
    %112 = tpu.matmul %111, %109, %cst_26 {dimension_numbers = #tpu.dot_dimension_numbers<[1], [0], [0], [1], [0, 0, 1, 1], [], []>} : vector<8x8xf32>, vector<8x320xf32>, vector<8x320xf32> -> vector<8x320xf32>
    %113 = arith.addf %108, %112 : vector<8x320xf32>
    %114 = vector.extract_strided_slice %1 {offsets = [0, 82], sizes = [8, 320], strides = [1, 1]} : vector<8x512xf32> to vector<8x320xf32>
    %115 = vector.extract_strided_slice %2 {offsets = [22, 0, 0], sizes = [1, 8, 8], strides = [1, 1, 1]} : vector<25x8x8xf32> to vector<1x8x8xf32>
    %116 = vector.shape_cast %115 : vector<1x8x8xf32> to vector<8x8xf32>
    %cst_27 = arith.constant dense<0.000000e+00> : vector<8x320xf32>
    %117 = tpu.matmul %116, %114, %cst_27 {dimension_numbers = #tpu.dot_dimension_numbers<[1], [0], [0], [1], [0, 0, 1, 1], [], []>} : vector<8x8xf32>, vector<8x320xf32>, vector<8x320xf32> -> vector<8x320xf32>
    %118 = arith.addf %113, %117 : vector<8x320xf32>
    %119 = vector.extract_strided_slice %1 {offsets = [0, 83], sizes = [8, 320], strides = [1, 1]} : vector<8x512xf32> to vector<8x320xf32>
    %120 = vector.extract_strided_slice %2 {offsets = [23, 0, 0], sizes = [1, 8, 8], strides = [1, 1, 1]} : vector<25x8x8xf32> to vector<1x8x8xf32>
    %121 = vector.shape_cast %120 : vector<1x8x8xf32> to vector<8x8xf32>
    %cst_28 = arith.constant dense<0.000000e+00> : vector<8x320xf32>
    %122 = tpu.matmul %121, %119, %cst_28 {dimension_numbers = #tpu.dot_dimension_numbers<[1], [0], [0], [1], [0, 0, 1, 1], [], []>} : vector<8x8xf32>, vector<8x320xf32>, vector<8x320xf32> -> vector<8x320xf32>
    %123 = arith.addf %118, %122 : vector<8x320xf32>
    %124 = vector.extract_strided_slice %1 {offsets = [0, 84], sizes = [8, 320], strides = [1, 1]} : vector<8x512xf32> to vector<8x320xf32>
    %125 = vector.extract_strided_slice %2 {offsets = [24, 0, 0], sizes = [1, 8, 8], strides = [1, 1, 1]} : vector<25x8x8xf32> to vector<1x8x8xf32>
    %126 = vector.shape_cast %125 : vector<1x8x8xf32> to vector<8x8xf32>
    %cst_29 = arith.constant dense<0.000000e+00> : vector<8x320xf32>
    %127 = tpu.matmul %126, %124, %cst_29 {dimension_numbers = #tpu.dot_dimension_numbers<[1], [0], [0], [1], [0, 0, 1, 1], [], []>} : vector<8x8xf32>, vector<8x320xf32>, vector<8x320xf32> -> vector<8x320xf32>
    %128 = arith.addf %123, %127 : vector<8x320xf32>
    %c0_30 = arith.constant 0 : index
    %c0_31 = arith.constant 0 : index
    %129 = vector.load %arg3[%c0_30, %c0_31] : memref<8x1xf32, #tpu.memory_space<vmem>>, vector<8x1xf32>
    %130 = vector.broadcast %129 : vector<8x1xf32> to vector<8x320xf32>
    %131 = arith.addf %128, %130 : vector<8x320xf32>
    %cst_32 = arith.constant 0.000000e+00 : f32
    %132 = vector.broadcast %cst_32 : f32 to vector<8x320xf32>
    %133 = arith.maximumf %131, %132 : vector<8x320xf32>
    %c0_33 = arith.constant 0 : index
    %c0_34 = arith.constant 0 : index
    %134 = vector.load %arg5[%c0_33, %c0_34] : memref<1x32xf32, #tpu.memory_space<vmem>>, vector<1x32xf32>
    %135 = vector.extract_strided_slice %133 {offsets = [0, 0], sizes = [1, 320], strides = [1, 1]} : vector<8x320xf32> to vector<1x320xf32>
    %c0_35 = arith.constant 0 : index
    %c0_36 = arith.constant 0 : index
    %c0_37 = arith.constant 0 : index
    %136 = vector.load %arg4[%c0_35, %c0_36, %c0_37] : memref<8x320x32xf32, #tpu.memory_space<vmem>>, vector<1x320x32xf32>
    %137 = vector.shape_cast %136 : vector<1x320x32xf32> to vector<320x32xf32>
    %cst_38 = arith.constant dense<0.000000e+00> : vector<1x32xf32>
    %138 = tpu.matmul %135, %137, %cst_38 {dimension_numbers = #tpu.dot_dimension_numbers<[1], [0], [0], [1], [0, 0, 1, 1], [], []>} : vector<1x320xf32>, vector<320x32xf32>, vector<1x32xf32> -> vector<1x32xf32>
    %139 = arith.addf %134, %138 : vector<1x32xf32>
    %140 = vector.extract_strided_slice %133 {offsets = [1, 0], sizes = [1, 320], strides = [1, 1]} : vector<8x320xf32> to vector<1x320xf32>
    %c1 = arith.constant 1 : index
    %c0_39 = arith.constant 0 : index
    %c0_40 = arith.constant 0 : index
    %141 = vector.load %arg4[%c1, %c0_39, %c0_40] : memref<8x320x32xf32, #tpu.memory_space<vmem>>, vector<1x320x32xf32>
    %142 = vector.shape_cast %141 : vector<1x320x32xf32> to vector<320x32xf32>
    %cst_41 = arith.constant dense<0.000000e+00> : vector<1x32xf32>
    %143 = tpu.matmul %140, %142, %cst_41 {dimension_numbers = #tpu.dot_dimension_numbers<[1], [0], [0], [1], [0, 0, 1, 1], [], []>} : vector<1x320xf32>, vector<320x32xf32>, vector<1x32xf32> -> vector<1x32xf32>
    %144 = arith.addf %139, %143 : vector<1x32xf32>
    %145 = vector.extract_strided_slice %133 {offsets = [2, 0], sizes = [1, 320], strides = [1, 1]} : vector<8x320xf32> to vector<1x320xf32>
    %c2 = arith.constant 2 : index
    %c0_42 = arith.constant 0 : index
    %c0_43 = arith.constant 0 : index
    %146 = vector.load %arg4[%c2, %c0_42, %c0_43] : memref<8x320x32xf32, #tpu.memory_space<vmem>>, vector<1x320x32xf32>
    %147 = vector.shape_cast %146 : vector<1x320x32xf32> to vector<320x32xf32>
    %cst_44 = arith.constant dense<0.000000e+00> : vector<1x32xf32>
    %148 = tpu.matmul %145, %147, %cst_44 {dimension_numbers = #tpu.dot_dimension_numbers<[1], [0], [0], [1], [0, 0, 1, 1], [], []>} : vector<1x320xf32>, vector<320x32xf32>, vector<1x32xf32> -> vector<1x32xf32>
    %149 = arith.addf %144, %148 : vector<1x32xf32>
    %150 = vector.extract_strided_slice %133 {offsets = [3, 0], sizes = [1, 320], strides = [1, 1]} : vector<8x320xf32> to vector<1x320xf32>
    %c3 = arith.constant 3 : index
    %c0_45 = arith.constant 0 : index
    %c0_46 = arith.constant 0 : index
    %151 = vector.load %arg4[%c3, %c0_45, %c0_46] : memref<8x320x32xf32, #tpu.memory_space<vmem>>, vector<1x320x32xf32>
    %152 = vector.shape_cast %151 : vector<1x320x32xf32> to vector<320x32xf32>
    %cst_47 = arith.constant dense<0.000000e+00> : vector<1x32xf32>
    %153 = tpu.matmul %150, %152, %cst_47 {dimension_numbers = #tpu.dot_dimension_numbers<[1], [0], [0], [1], [0, 0, 1, 1], [], []>} : vector<1x320xf32>, vector<320x32xf32>, vector<1x32xf32> -> vector<1x32xf32>
    %154 = arith.addf %149, %153 : vector<1x32xf32>
    %155 = vector.extract_strided_slice %133 {offsets = [4, 0], sizes = [1, 320], strides = [1, 1]} : vector<8x320xf32> to vector<1x320xf32>
    %c4 = arith.constant 4 : index
    %c0_48 = arith.constant 0 : index
    %c0_49 = arith.constant 0 : index
    %156 = vector.load %arg4[%c4, %c0_48, %c0_49] : memref<8x320x32xf32, #tpu.memory_space<vmem>>, vector<1x320x32xf32>
    %157 = vector.shape_cast %156 : vector<1x320x32xf32> to vector<320x32xf32>
    %cst_50 = arith.constant dense<0.000000e+00> : vector<1x32xf32>
    %158 = tpu.matmul %155, %157, %cst_50 {dimension_numbers = #tpu.dot_dimension_numbers<[1], [0], [0], [1], [0, 0, 1, 1], [], []>} : vector<1x320xf32>, vector<320x32xf32>, vector<1x32xf32> -> vector<1x32xf32>
    %159 = arith.addf %154, %158 : vector<1x32xf32>
    %160 = vector.extract_strided_slice %133 {offsets = [5, 0], sizes = [1, 320], strides = [1, 1]} : vector<8x320xf32> to vector<1x320xf32>
    %c5 = arith.constant 5 : index
    %c0_51 = arith.constant 0 : index
    %c0_52 = arith.constant 0 : index
    %161 = vector.load %arg4[%c5, %c0_51, %c0_52] : memref<8x320x32xf32, #tpu.memory_space<vmem>>, vector<1x320x32xf32>
    %162 = vector.shape_cast %161 : vector<1x320x32xf32> to vector<320x32xf32>
    %cst_53 = arith.constant dense<0.000000e+00> : vector<1x32xf32>
    %163 = tpu.matmul %160, %162, %cst_53 {dimension_numbers = #tpu.dot_dimension_numbers<[1], [0], [0], [1], [0, 0, 1, 1], [], []>} : vector<1x320xf32>, vector<320x32xf32>, vector<1x32xf32> -> vector<1x32xf32>
    %164 = arith.addf %159, %163 : vector<1x32xf32>
    %165 = vector.extract_strided_slice %133 {offsets = [6, 0], sizes = [1, 320], strides = [1, 1]} : vector<8x320xf32> to vector<1x320xf32>
    %c6 = arith.constant 6 : index
    %c0_54 = arith.constant 0 : index
    %c0_55 = arith.constant 0 : index
    %166 = vector.load %arg4[%c6, %c0_54, %c0_55] : memref<8x320x32xf32, #tpu.memory_space<vmem>>, vector<1x320x32xf32>
    %167 = vector.shape_cast %166 : vector<1x320x32xf32> to vector<320x32xf32>
    %cst_56 = arith.constant dense<0.000000e+00> : vector<1x32xf32>
    %168 = tpu.matmul %165, %167, %cst_56 {dimension_numbers = #tpu.dot_dimension_numbers<[1], [0], [0], [1], [0, 0, 1, 1], [], []>} : vector<1x320xf32>, vector<320x32xf32>, vector<1x32xf32> -> vector<1x32xf32>
    %169 = arith.addf %164, %168 : vector<1x32xf32>
    %170 = vector.extract_strided_slice %133 {offsets = [7, 0], sizes = [1, 320], strides = [1, 1]} : vector<8x320xf32> to vector<1x320xf32>
    %c7 = arith.constant 7 : index
    %c0_57 = arith.constant 0 : index
    %c0_58 = arith.constant 0 : index
    %171 = vector.load %arg4[%c7, %c0_57, %c0_58] : memref<8x320x32xf32, #tpu.memory_space<vmem>>, vector<1x320x32xf32>
    %172 = vector.shape_cast %171 : vector<1x320x32xf32> to vector<320x32xf32>
    %cst_59 = arith.constant dense<0.000000e+00> : vector<1x32xf32>
    %173 = tpu.matmul %170, %172, %cst_59 {dimension_numbers = #tpu.dot_dimension_numbers<[1], [0], [0], [1], [0, 0, 1, 1], [], []>} : vector<1x320xf32>, vector<320x32xf32>, vector<1x32xf32> -> vector<1x32xf32>
    %174 = arith.addf %169, %173 : vector<1x32xf32>
    %cst_60 = arith.constant 0.000000e+00 : f32
    %175 = vector.broadcast %cst_60 : f32 to vector<1x32xf32>
    %176 = arith.maximumf %174, %175 : vector<1x32xf32>
    %c0_61 = arith.constant 0 : index
    %c0_62 = arith.constant 0 : index
    %177 = vector.load %arg6[%c0_61, %c0_62] : memref<32x10xf32, #tpu.memory_space<vmem>>, vector<32x10xf32>
    %cst_63 = arith.constant dense<0.000000e+00> : vector<1x10xf32>
    %178 = tpu.matmul %176, %177, %cst_63 {dimension_numbers = #tpu.dot_dimension_numbers<[1], [0], [0], [1], [0, 0, 1, 1], [], []>} : vector<1x32xf32>, vector<32x10xf32>, vector<1x10xf32> -> vector<1x10xf32>
    %c0_64 = arith.constant 0 : index
    %c0_65 = arith.constant 0 : index
    %179 = vector.load %arg7[%c0_64, %c0_65] : memref<1x10xf32, #tpu.memory_space<vmem>>, vector<1x10xf32>
    %180 = arith.addf %178, %179 : vector<1x10xf32>
    %181 = vector.shape_cast %180 : vector<1x10xf32> to vector<1x1x10xf32>
    %c0_66 = arith.constant 0 : index
    %c0_67 = arith.constant 0 : index
    %c0_68 = arith.constant 0 : index
    %182 = vector.load %arg8[%c0_66, %c0_67, %c0_68] : memref<1x1x10xf32, #tpu.memory_space<vmem>>, vector<1x1x10xf32>
    tpu.vector_store %arg8[%c0_66, %c0_67, %c0_68], %181 {strides = array<i32>} : memref<1x1x10xf32, #tpu.memory_space<vmem>>, vector<1x1x10xf32>,
    return
  }
  func.func @transform_0(%arg0: i32) -> (i32, i32, i32) {
    %c0_i32 = arith.constant 0 : i32
    %c0_i32_0 = arith.constant 0 : i32
    %c0_i32_1 = arith.constant 0 : i32
    return %arg0, %c0_i32, %c0_i32_0 : i32, i32, i32
  }
  func.func @transform_1(%arg0: i32) -> (i32, i32, i32) {
    %c0_i32 = arith.constant 0 : i32
    %c0_i32_0 = arith.constant 0 : i32
    %c0_i32_1 = arith.constant 0 : i32
    %c0_i32_2 = arith.constant 0 : i32
    return %c0_i32, %c0_i32_0, %c0_i32_1 : i32, i32, i32
  }
  func.func @transform_2(%arg0: i32) -> (i32, i32) {
    %c0_i32 = arith.constant 0 : i32
    %c0_i32_0 = arith.constant 0 : i32
    %c0_i32_1 = arith.constant 0 : i32
    return %c0_i32, %c0_i32_0 : i32, i32
  }
  func.func @transform_3(%arg0: i32) -> (i32, i32, i32) {
    %c0_i32 = arith.constant 0 : i32
    %c0_i32_0 = arith.constant 0 : i32
    %c0_i32_1 = arith.constant 0 : i32
    %c0_i32_2 = arith.constant 0 : i32
    return %c0_i32, %c0_i32_0, %c0_i32_1 : i32, i32, i32
  }
  func.func @transform_4(%arg0: i32) -> (i32, i32) {
    %c0_i32 = arith.constant 0 : i32
    %c0_i32_0 = arith.constant 0 : i32
    %c0_i32_1 = arith.constant 0 : i32
    return %c0_i32, %c0_i32_0 : i32, i32
  }
  func.func @transform_5(%arg0: i32) -> (i32, i32) {
    %c0_i32 = arith.constant 0 : i32
    %c0_i32_0 = arith.constant 0 : i32
    %c0_i32_1 = arith.constant 0 : i32
    return %c0_i32, %c0_i32_0 : i32, i32
  }
  func.func @transform_6(%arg0: i32) -> (i32, i32) {
    %c0_i32 = arith.constant 0 : i32
    %c0_i32_0 = arith.constant 0 : i32
    %c0_i32_1 = arith.constant 0 : i32
    return %c0_i32, %c0_i32_0 : i32, i32
  }
  func.func @transform_7(%arg0: i32) -> (i32, i32, i32) {
    %c0_i32 = arith.constant 0 : i32
    %c0_i32_0 = arith.constant 0 : i32
    %c0_i32_1 = arith.constant 0 : i32
    return %arg0, %c0_i32, %c0_i32_0 : i32, i32, i32
  }
}

</mosaic_0001>

<bundles_post_ra>
// kernel: forward.1
= control target key start
LH: loop header
LB: loop body
LE: loop exit
PB: predicated region body
PF: predicated region fallthrough
CT: control target
= control target key end

     0   :  { %12 = vsyncpa [#allocation3], 0  ;;  %s9315_s0 = inlined_call_operand.vmem [shape: f32[2,8,512], index: 0, kind: input, shape index: {}]   ;;  %s9316_s1 = inlined_call_operand.vmem [shape: f32[25,8,8], index: 1, kind: input, shape index: {}]   ;;  %s9317_s2 = inlined_call_operand.vmem [shape: f32[8,1], index: 2, kind: input, shape index: {}]   ;;  %s9318_s3 = inlined_call_operand.vmem [shape: f32[8,320,32], index: 3, kind: input, shape index: {}]   ;;  %s9319_s4 = inlined_call_operand.vmem [shape: f32[1,32], index: 4, kind: input, shape index: {}]   ;;  %s9320_s5 = inlined_call_operand.vmem [shape: f32[32,10], index: 5, kind: input, shape index: {}]   ;;  %s9321_s6 = inlined_call_operand.vmem [shape: f32[1,10], index: 6, kind: input, shape index: {}]   ;;  %s9322_s7 = inlined_call_operand.hbm [shape: f32[2,1,10], index: 7, kind: output, shape index: {}]  }
   0x1   :  { %14 = vsyncpa [#allocation3 + $0x1], 0  ;;  %s7629_s24 = smov 0   ;;  %s7631_s25 = smov 0  }
   0x2   :  { %s7633_s26 = smov 0   ;;  %s7635_s27 = smov 0  }
   0x3 LB: > { %s7650_s28 = sadd.s32 4294967295, %s7558_s27   ;;  %s5954_s29 = sadd.s32 4294967294, %s7558_s27   ;;  %s7558_s27 = sphi %s7635_s27, %s9328_s27   ;;  %s7554_s26 = sphi %s7633_s26, %s9327_s26   ;;  %s7550_s25 = sphi %s7631_s25, %s9326_s25   ;;  %s7546_s24 = sphi %s7629_s24, %s9325_s24  }
   0x4   : > { %s7654_s30 = sadd.s32 1, %s7558_s27   ;;  %s179_s8 = sadd.s32 1, %s7554_s26 }
   0x5   : > { %s176_s9 = ssub.s32 %s7558_s27, %s7654_s30  ;;  %p189_p0 = scmp.ne.s32.totalorder %s7554_s26, %s7550_s25 }
   0x6   : > { %p177_p1 = scmp.eq.s32.totalorder %s176_s9, 0  ;;  %p190_p2 = scmp.eq.s32.totalorder %s7650_s28, 1 }
   0x7   : > { %p195_p3 = scmp.ne.s32.totalorder %s7550_s25, %s7546_s24  ;;  %p196_p4 = scmp.eq.s32.totalorder %s5954_s29, 1 }
   0x8   : > { %s7665_s10 = scalar_select %p177_p1, %s7554_s26, %s179_s8  }
   0x9   : > { %p7667_p5 = por %p190_p2, %p189_p0  ;;  %p7671_p6 = por %p196_p4, %p195_p3 }
   0xa   : > { %p5957_p7 = scmp.ge.s32.totalorder %s7558_s27, 1  ;;  %p240_p8 = scmp.lt.s32.totalorder %s7558_s27, 3 }
   0xc   : > { %p241_p9 = pnand %p5957_p7, %p240_p8 }
   0xd   : > { %p271_p10 = scmp.lt.s32.totalorder (!%p241_p9), %s7650_s28, 1  ;;  %v7560_v0 = vmov (!%p241_p9), 0.0   ;;  %s7561_s18 = smov (!%p241_p9), 126   ;;  %v7697_v3 = vld [vmem:[%s9316_s1] sm:$0xff] (!%p241_p9)  ;;  %vm320_vm0 = vcmask (!%p241_p9), 64512   ;;  %vm615_vm1 = vcmask (!%p241_p9), 1031168  }
   0xe   : > { %244 = sbr.rel (%p241_p9) target bundleno = 1153 (0x481), region = 48  ;;  %532 = vmatprep.mubr.f32.mxu0 (!%p241_p9), %v7560_v0  ;;  %388 = vmatprep.mubr.f32.mxu1 (!%p241_p9), %v7560_v0  ;;  %s7562_s21 = smov (!%p241_p9), 125   ;;  %v7774_v11 = vld [vmem:[%s9316_s1 + $0x10] sm:$0xff] (!%p241_p9)  ;;  %vm774_vm2 = vcmask (!%p241_p9), 1022976   ;;  %vm933_vm3 = vcmask (!%p241_p9), 1014784   ;;  %v7791_v19 = vld [vmem:[%s9316_s1 + $0x18] sm:$0xff] (!%p241_p9) }
   0xf   : > { %s7563_s22 = smov (!%p241_p9), 124   ;;  %s7564_s23 = smov (!%p241_p9), 108   ;;  %vm1092_vm4 = vcmask (!%p241_p9), 883712   ;;  %v7806_v26 = vld [vmem:[%s9316_s1 + $0x20] sm:$0xff] (!%p241_p9)  ;;  %vm1251_vm5 = vcmask (!%p241_p9), 875520   ;;  %v7823_v34 = vld [vmem:[%s9316_s1 + $0x28] sm:$0xff] (!%p241_p9) }
  0x10   : > { %s7565_s29 = smov (!%p241_p9), 107   ;;  %s7566_s8 = smov (!%p241_p9), 106   ;;  %vm1410_vm6 = vcmask (!%p241_p9), 867328   ;;  %vm1569_vm7 = vcmask (!%p241_p9), 859136   ;;  %v7842_v41 = vld [vmem:[%s9316_s1 + $0x30] sm:$0xff] (!%p241_p9)  ;;  %vm1728_vm8 = vcmask (!%p241_p9), 850944  }
  0x11   : > { %s7567_s9 = smov (!%p241_p9), 105   ;;  %s7570_s15 = smov (!%p241_p9), 127   ;;  %v7855_v48 = vld [vmem:[%s9316_s1 + $0x38] sm:$0xff] (!%p241_p9)  ;;  %vm1887_vm9 = vcmask (!%p241_p9), 719872   ;;  %v7866_v55 = vld [vmem:[%s9316_s1 + $0x40] sm:$0xff] (!%p241_p9)  ;;  %vm314_vm10 = vcmask (!%p241_p9), 1039360  }
  0x12   : > { %s7571_s16 = smov (!%p241_p9), 87   ;;  %s7573_s19 = smov (!%p241_p9), 85   ;;  %v281_v62 = vld [vmem:[%s9316_s1 + $0x8] sm:$0xff] (!%p241_p9)  ;;  %v7585_v63 = vmov (!%p241_p9), 0   ;;  %vm7586_vm11 = vmmov (!%p241_p9), 0   ;;  %vm2046_vm12 = vcmask (!%p241_p9), 711680  }
  0x13   : > { %s7574_s20 = smov (!%p241_p9), 84   ;;  %7494 = vset.pattern.permute.xlu1 (!%p241_p9), %v7585_v63  ;;  %7495 = vset.pattern.permute.xlu0 (!%p241_p9), %v7585_v63  ;;  %vm2205_vm13 = vcmask (!%p241_p9), 703488   ;;  %vm2364_vm14 = vcmask (!%p241_p9), 695296   ;;  %vm2523_vm15 = vcmask (!%p241_p9), 687104  }
  0x15   : > { %s272_s13 = scalar_select %p271_p10, %s7650_s28, 1 }
  0x17   : > { %s6302_s14 = sshll.u32 %s272_s13, 5  ;;  %s7568_s13 = smov 104  }
  0x18   : > { %s7684_s17 = scalar_lea.vmem %s9315_s0, %s6302_s14  ;;  %s7569_s14 = smov 88  }
  0x19   : > { %v7687_v1 = vld [vmem:[%s7684_s17 + $0x8] sm:$0xff]  ;;  %v7690_v2 = vld [vmem:[%s7684_s17] sm:$0xff]  ;;  %v7700_v4 = vld [vmem:[%s7684_s17 + $0x10] sm:$0xff] }
  0x1a   : > { %611 = vrot.lane.b32.xlu0 %v7687_v1, %s7561_s18  ;;  %609 = vrot.lane.b32.xlu1 %v7690_v2, %s7561_s18  ;;  %v7766_v7 = vld [vmem:[%s7684_s17 + $0x18] sm:$0xff] }
  0x1b   : > { %468 = vmatprep.subr.mxu0 %v7687_v1 }
  0x1c   : > { %469 = vmatpush1.msra.mxu0 %v7690_v2 }
  0x1d   : > { %5962 = vmatmul.mubr.msk.f32.vlgmr.msra.gmra.mrb[0].mxu0 %vm320_vm0, %v7697_v3 }
  0x1e   : > { %613 = vrot.lane.b32.xlu0 %v7700_v4, %s7561_s18  ;;  %770 = vrot.lane.b32.xlu1 %v7687_v1, %s7562_s21  ;;  %s7572_s18 = smov 86  }
  0x1f   : > { %688 = vmatprep.mubr.f32.mxu0 %v7560_v0 }
  0x22   : > { %772 = vrot.lane.b32.xlu0 %v7700_v4, %s7562_s21  ;;  %768 = vrot.lane.b32.xlu1 %v7690_v2, %s7562_s21  ;;  %s7575_s21 = smov 68  }
  0x26   : > { %929 = vrot.lane.b32.xlu0 %v7687_v1, %s7563_s22  ;;  %931 = vrot.lane.b32.xlu1 %v7700_v4, %s7563_s22 }
  0x2a   : > { %927 = vrot.lane.b32.xlu0 %v7690_v2, %s7563_s22  ;;  %1088 = vrot.lane.b32.xlu1 %v7687_v1, %s7564_s23  ;;  %s7576_s22 = smov 67  }
  0x2e   : > { %1090 = vrot.lane.b32.xlu0 %v7700_v4, %s7564_s23  ;;  %1086 = vrot.lane.b32.xlu1 %v7690_v2, %s7564_s23  ;;  %s7577_s23 = smov 66  }
  0x32   : > { %1247 = vrot.lane.b32.xlu0 %v7687_v1, %s7565_s29  ;;  %1249 = vrot.lane.b32.xlu1 %v7700_v4, %s7565_s29 }
  0x36   : > { %1245 = vrot.lane.b32.xlu0 %v7690_v2, %s7565_s29  ;;  %1406 = vrot.lane.b32.xlu1 %v7687_v1, %s7566_s8  ;;  %s7578_s29 = smov 65  }
  0x3a   : > { %1408 = vrot.lane.b32.xlu0 %v7700_v4, %s7566_s8  ;;  %1404 = vrot.lane.b32.xlu1 %v7690_v2, %s7566_s8  ;;  %s7579_s8 = smov 64  }
  0x3e   : > { %1565 = vrot.lane.b32.xlu0 %v7687_v1, %s7567_s9  ;;  %1567 = vrot.lane.b32.xlu1 %v7700_v4, %s7567_s9 }
  0x42   : > { %1563 = vrot.lane.b32.xlu0 %v7690_v2, %s7567_s9  ;;  %1724 = vrot.lane.b32.xlu1 %v7687_v1, %s7568_s13  ;;  %s7580_s9 = smov 48  }
  0x46   : > { %1726 = vrot.lane.b32.xlu0 %v7700_v4, %s7568_s13  ;;  %1722 = vrot.lane.b32.xlu1 %v7690_v2, %s7568_s13 }
  0x4a   : > { %1883 = vrot.lane.b32.xlu0 %v7687_v1, %s7569_s14  ;;  %1885 = vrot.lane.b32.xlu1 %v7700_v4, %s7569_s14 }
  0x4e   : > { %1881 = vrot.lane.b32.xlu0 %v7690_v2, %s7569_s14  ;;  %310 = vrot.lane.b32.xlu1 %v7687_v1, %s7570_s15 }
  0x52   : > { %312 = vrot.lane.b32.xlu0 %v7700_v4, %s7570_s15  ;;  %308 = vrot.lane.b32.xlu1 %v7690_v2, %s7570_s15  ;;  %s7581_s15 = smov 47  }
  0x56   : > { %2042 = vrot.lane.b32.xlu0 %v7687_v1, %s7571_s16  ;;  %2044 = vrot.lane.b32.xlu1 %v7700_v4, %s7571_s16 }
  0x5a   : > { %2040 = vrot.lane.b32.xlu0 %v7690_v2, %s7571_s16  ;;  %2201 = vrot.lane.b32.xlu1 %v7687_v1, %s7572_s18  ;;  %s269_s16 = sand.u32 1, %s7550_s25  }
  0x5e   : > { %2203 = vrot.lane.b32.xlu0 %v7700_v4, %s7572_s18  ;;  %2199 = vrot.lane.b32.xlu1 %v7690_v2, %s7572_s18  ;;  %s7582_s18 = smov 46  }
  0x62   : > { %2360 = vrot.lane.b32.xlu0 %v7687_v1, %s7573_s19  ;;  %2362 = vrot.lane.b32.xlu1 %v7700_v4, %s7573_s19 }
  0x66   : > { %2358 = vrot.lane.b32.xlu0 %v7690_v2, %s7573_s19  ;;  %2519 = vrot.lane.b32.xlu1 %v7687_v1, %s7574_s20 }
  0x6a   : > { %2521 = vrot.lane.b32.xlu0 %v7700_v4, %s7574_s20  ;;  %2517 = vrot.lane.b32.xlu1 %v7690_v2, %s7574_s20  ;;  %s6299_s20 = sshll.u32 %s7650_s28, 4  ;;  %s7588_s28 = smov [#allocation2]  }
  0x6b   : > { %s7500_s14 = sshll.u32 %s7588_s28, 4  ;;  %s7501_s14 = int_to_ptr.vmem [resolvable:$false] %s7500_s14 }
  0x6e   : > { %2678 = vrot.lane.b32.xlu0 %v7687_v1, %s7575_s21  ;;  %2680 = vrot.lane.b32.xlu1 %v7700_v4, %s7575_s21 }
  0x72   : > { %2676 = vrot.lane.b32.xlu0 %v7690_v2, %s7575_s21  ;;  %2837 = vrot.lane.b32.xlu1 %v7687_v1, %s7576_s22  ;;  %s7583_s21 = smov 45  }
  0x76   : > { %2839 = vrot.lane.b32.xlu0 %v7700_v4, %s7576_s22  ;;  %2835 = vrot.lane.b32.xlu1 %v7690_v2, %s7576_s22 }
  0x7a   : > { %2996 = vrot.lane.b32.xlu0 %v7687_v1, %s7577_s23  ;;  %2998 = vrot.lane.b32.xlu1 %v7700_v4, %s7577_s23 }
  0x7e   : > { %2994 = vrot.lane.b32.xlu0 %v7690_v2, %s7577_s23  ;;  %3155 = vrot.lane.b32.xlu1 %v7687_v1, %s7578_s29 }
  0x82   : > { %3157 = vrot.lane.b32.xlu0 %v7700_v4, %s7578_s29  ;;  %3153 = vrot.lane.b32.xlu1 %v7690_v2, %s7578_s29  ;;  %s7584_s29 = smov 44  }
  0x86   : > { %3314 = vrot.lane.b32.xlu0 %v7687_v1, %s7579_s8  ;;  %3316 = vrot.lane.b32.xlu1 %v7700_v4, %s7579_s8 }
  0x8a   : > { %3312 = vrot.lane.b32.xlu0 %v7690_v2, %s7579_s8  ;;  %3474 = vrot.lane.b32.xlu1 %v7687_v1, %s7580_s9  ;;  %s9273_s8 = scalar_lea.hbm %s9322_s7, %s6299_s20 }
  0x8c   : > { %v612_v5 = vpop.permute.xlu0 %611  ;;  %v610_v6 = vpop.permute.xlu1 %609 }
  0x8d   : > { %v616_v12 = vsel %vm615_vm1, %v610_v6, %v612_v5  ;;  %v7888_v6 = vld [vmem:[%s9316_s1 + $0x48] sm:$0xff] }
  0x8e   : > { %3476 = vrot.lane.b32.xlu0 %v7700_v4, %s7580_s9  ;;  %3472 = vrot.lane.b32.xlu1 %v7690_v2, %s7580_s9 }
  0x90   : > { %v7768_v8 = vpop.permute.xlu0 %613  ;;  %v771_v9 = vpop.permute.xlu1 %770 }
  0x91   : > { %v617_v10 = vsel %vm615_vm1, %v612_v5, %v7768_v8  ;;  %vm2682_vm1 = vcmask 556032  }
  0x92   : > { %624 = vmatprep.subr.mxu0 %v617_v10  ;;  %3478 = vrot.lane.b32.xlu0 %v7766_v7, %s7580_s9  ;;  %s5887_s9 = scalar_lea.sflag [#allocation3], %s269_s16 }
  0x93   : > { %625 = vmatpush1.msra.mxu0 %v616_v12  ;;  %3636 = vrot.lane.b32.xlu1 %v7687_v1, %s7581_s15 }
  0x94   : > { %v7778_v13 = vpop.permute.xlu0 %772  ;;  %5964 = vmatmul.mubr.msk.f32.vlgmr.msra.gmra.mrb[0].mxu0 %vm320_vm0, %v7774_v11  ;;  %v769_v14 = vpop.permute.xlu1 %768 }
  0x95   : > { %v775_v15 = vsel %vm774_vm2, %v769_v14, %v771_v9  ;;  %v776_v16 = vsel %vm774_vm2, %v771_v9, %v7778_v13  ;;  %847 = vmatprep.mubr.f32.mxu0 %v7560_v0  ;;  %vm2841_vm2 = vcmask 547840  }
  0x96   : > { %783 = vmatprep.subr.mxu0 %v776_v16  ;;  %3638 = vrot.lane.b32.xlu0 %v7700_v4, %s7581_s15 }
  0x97   : > { %784 = vmatpush1.msra.mxu0 %v775_v15  ;;  %3634 = vrot.lane.b32.xlu1 %v7690_v2, %s7581_s15 }
  0x98   : > { %v930_v17 = vpop.permute.xlu0 %929  ;;  %v7786_v18 = vpop.permute.xlu1 %931 }
  0x99   : > { %v935_v20 = vsel %vm933_vm3, %v930_v17, %v7786_v18 }
  0x9a   : > { %942 = vmatprep.subr.mxu0 %v935_v20  ;;  %3640 = vrot.lane.b32.xlu0 %v7766_v7, %s7581_s15  ;;  %s7502_s15 = scalar_lea.vmem %s7501_s14, 32 }
  0x9b   : > { %3798 = vrot.lane.b32.xlu1 %v7687_v1, %s7582_s18 }
  0x9c   : > { %v928_v21 = vpop.permute.xlu0 %927  ;;  %5966 = vmatmul.mubr.msk.f32.vlgmr.msra.gmra.mrb[0].mxu0 %vm320_vm0, %v7791_v19  ;;  %v1089_v22 = vpop.permute.xlu1 %1088 }
  0x9d   : > { %v934_v23 = vsel %vm933_vm3, %v928_v21, %v930_v17  ;;  %1006 = vmatprep.mubr.f32.mxu0 %v7560_v0  ;;  %vm3000_vm3 = vcmask 539648  }
  0x9e   : > { %943 = vmatpush1.msra.mxu0 %v934_v23  ;;  %3800 = vrot.lane.b32.xlu0 %v7700_v4, %s7582_s18 }
  0x9f   : > { %3802 = vrot.lane.b32.xlu1 %v7766_v7, %s7582_s18 }
  0xa0   : > { %v7801_v24 = vpop.permute.xlu0 %1090  ;;  %v1087_v25 = vpop.permute.xlu1 %1086 }
  0xa1   : > { %v1094_v27 = vsel %vm1092_vm4, %v1089_v22, %v7801_v24  ;;  %v1093_v28 = vsel %vm1092_vm4, %v1087_v25, %v1089_v22  ;;  %vm3159_vm4 = vcmask 531456  }
  0xa2   : > { %1101 = vmatprep.subr.mxu0 %v1094_v27  ;;  %3796 = vrot.lane.b32.xlu0 %v7690_v2, %s7582_s18 }
  0xa3   : > { %3962 = vrot.lane.b32.xlu1 %v7700_v4, %s7583_s21 }
  0xa4   : > { %v1248_v29 = vpop.permute.xlu0 %1247  ;;  %5968 = vmatmul.mubr.msk.f32.vlgmr.msra.gmra.mrb[0].mxu0 %vm320_vm0, %v7806_v26  ;;  %v7813_v30 = vpop.permute.xlu1 %1249 }
  0xa5   : > { %1102 = vmatpush1.msra.mxu0 %v1093_v28  ;;  %1165 = vmatprep.mubr.f32.mxu0 %v7560_v0  ;;  %v1253_v31 = vsel %vm1251_vm5, %v1248_v29, %v7813_v30 }
  0xa6   : > { %1260 = vmatprep.subr.mxu0 %v1253_v31  ;;  %3964 = vrot.lane.b32.xlu0 %v7766_v7, %s7583_s21 }
  0xa7   : > { %3960 = vrot.lane.b32.xlu1 %v7687_v1, %s7583_s21 }
  0xa8   : > { %v1246_v32 = vpop.permute.xlu0 %1245  ;;  %v1407_v33 = vpop.permute.xlu1 %1406 }
  0xa9   : > { %v1252_v35 = vsel %vm1251_vm5, %v1246_v32, %v1248_v29  ;;  %v293_v32 = vld [vmem:[%s9316_s1 + $0x68] sm:$0xff]  ;;  %vm3318_vm5 = vcmask 523264  }
  0xaa   : > { %4124 = vrot.lane.b32.xlu0 %v7700_v4, %s7584_s29 }
  0xab   : > { %4126 = vrot.lane.b32.xlu1 %v7766_v7, %s7584_s29 }
  0xac   : > { %v7828_v36 = vpop.permute.xlu0 %1408  ;;  %5970 = vmatmul.mubr.msk.f32.vlgmr.msra.gmra.mrb[0].mxu0 %vm320_vm0, %v7823_v34  ;;  %v1405_v37 = vpop.permute.xlu1 %1404 }
  0xad   : > { %1261 = vmatpush1.msra.mxu0 %v1252_v35  ;;  %1324 = vmatprep.mubr.f32.mxu0 %v7560_v0  ;;  %v1412_v38 = vsel %vm1410_vm6, %v1407_v33, %v7828_v36  ;;  %v1411_v42 = vsel %vm1410_vm6, %v1405_v37, %v1407_v33  ;;  %vm3480_vm6 = vcmask 392192  }
  0xae   : > { %1419 = vmatprep.subr.mxu0 %v1412_v38  ;;  %3958 = vrot.lane.b32.xlu0 %v7690_v2, %s7583_s21  ;;  %s270_s21 = scalar_lea.vmem [#allocation2], %s269_s16 }
  0xaf   : > { %4122 = vrot.lane.b32.xlu1 %v7687_v1, %s7584_s29  ;;  %v4282_v1 = vld [vmem:[%s9317_s2] sm:$0xff]  ;;  %s5899_s22 = sshll.u32 %s270_s21, 4  ;;  %s9275_s22 = int_to_ptr.vmem [resolvable:$true] %s5899_s22 }
  0xb0   : > { %v1566_v39 = vpop.permute.xlu0 %1565  ;;  %v7837_v40 = vpop.permute.xlu1 %1567  ;;  %s7496_s13 = scalar_lea.vmem %s9275_s22, 16  ;;  %p7503_p0 = scmp.lt.s32.totalorder %s9275_s22, %s7501_s14 }
  0xb1   : > { %v1571_v43 = vsel %vm1569_vm7, %v1566_v39, %v7837_v40  ;;  %p7497_p11 = scmp.ne.s32.totalorder %s9275_s22, %s7496_s13  ;;  %p7504_p1 = scmp.lt.s32.totalorder %s7502_s15, %s7496_s13 }
  0xb2   : > { %4120 = vrot.lane.b32.xlu0 %v7690_v2, %s7584_s29 }
  0xb3   : > { %4285 = vperm.xlu1 %7494, %v4282_v1   ;;  %p7498_p12 = pnand %p7497_p11, %p7667_p5  ;;  %p7505_p2 = por %p7504_p1, %p7503_p0 }
  0xb4   : > { %v1564_v44 = vpop.permute.xlu0 %1563  ;;  %5972 = vmatmul.mubr.msk.f32.vlgmr.msra.gmra.mrb[0].mxu0 %vm320_vm0, %v7842_v41  ;;  %v1725_v45 = vpop.permute.xlu1 %1724 }
  0xb5   : > { %1420 = vmatpush1.msra.mxu0 %v1411_v42  ;;  %1483 = vmatprep.mubr.f32.mxu0 %v7560_v0  ;;  %v1570_v49 = vsel %vm1569_vm7, %v1564_v44, %v1566_v39  ;;  %v294_v39 = vld [vmem:[%s9316_s1 + $0x70] sm:$0xff]  ;;  %vm3642_vm7 = vcmask 384000   ;;  %p7499_p13 = pneg %p7498_p12 }
  0xb6   : > { %1578 = vmatprep.subr.mxu0 %v1571_v43 }
  0xb7   : > { %p7506_p3 = pnand %p7505_p2, %p7499_p13 }
  0xb8   : > { %v7850_v46 = vpop.permute.xlu0 %1726  ;;  %v1723_v47 = vpop.permute.xlu1 %1722 }
  0xb9   : > { %v1730_v50 = vsel %vm1728_vm8, %v1725_v45, %v7850_v46  ;;  %v1729_v56 = vsel %vm1728_vm8, %v1723_v47, %v1725_v45  ;;  %vm3804_vm8 = vcmask 375808  }
  0xbc   : > { %v1884_v51 = vpop.permute.xlu0 %1883  ;;  %5974 = vmatmul.mubr.msk.f32.vlgmr.msra.gmra.mrb[0].mxu0 %vm320_vm0, %v7855_v48  ;;  %v7860_v52 = vpop.permute.xlu1 %1885 }
  0xbd   : > { %1579 = vmatpush1.msra.mxu0 %v1570_v49  ;;  %1642 = vmatprep.mubr.f32.mxu0 %v7560_v0  ;;  %v1889_v57 = vsel %vm1887_vm9, %v1884_v51, %v7860_v52 }
  0xbe   : > { %1737 = vmatprep.subr.mxu0 %v1730_v50 }
  0xc0   : > { %v1882_v53 = vpop.permute.xlu0 %1881  ;;  %v311_v54 = vpop.permute.xlu1 %310 }
  0xc1   : > { %v1888_v7 = vsel %vm1887_vm9, %v1882_v53, %v1884_v51  ;;  %v296_v53 = vld [vmem:[%s9316_s1 + $0x80] sm:$0xff]  ;;  %vm3966_vm9 = vcmask 367616  }
  0xc4   : > { %v313_v58 = vpop.permute.xlu0 %312  ;;  %5976 = vmatmul.mubr.msk.f32.vlgmr.msra.gmra.mrb[0].mxu0 %vm320_vm0, %v7866_v55  ;;  %v309_v59 = vpop.permute.xlu1 %308 }
  0xc5   : > { %v316_v60 = vsel %vm314_vm10, %v311_v54, %v313_v58  ;;  %1738 = vmatpush1.msra.mxu0 %v1729_v56  ;;  %v315_v61 = vsel %vm314_vm10, %v309_v59, %v311_v54  ;;  %1801 = vmatprep.mubr.f32.mxu0 %v7560_v0  ;;  %v297_v59 = vld [vmem:[%s9316_s1 + $0x88] sm:$0xff]  ;;  %vm4128_vm10 = vcmask 359424  }
  0xc6   : > { %324 = vmatprep.subr.mxu1 %v316_v60  ;;  %1896 = vmatprep.subr.mxu0 %v1889_v57 }
  0xc7   : > { %325 = vmatpush1.msra.mxu1 %v315_v61 }
  0xc8   : > { %5960 = vmatmul.mubr.msk.f32.vlgmr.msra.gmra.mrb[0].mxu1 %vm320_vm0, %v281_v62  ;;  %6710 = vmatprep.subr.mxu1 %v7560_v0  ;;  %v2043_v2 = vpop.permute.xlu0 %2042  ;;  %v7881_v5 = vpop.permute.xlu1 %2044 }
  0xc9   : > { %6711 = vmatpush3.msra.mxu1 %v313_v58  ;;  %6712 = vmatprep.mubr.msk.f32.mxu1 %vm7586_vm11, %v7560_v0  ;;  %v2048_v10 = vsel %vm2046_vm12, %v2043_v2, %v7881_v5 }
  0xca   : > { %6715 = vmatprep.subr.mxu1 %v7560_v0 }
  0xcc   : > { %6713 = vmatmul.mubr.msk.f32.vlgmr.msra.gmra.mrb[2].mxu1 %vm320_vm0, %v281_v62  ;;  %5978 = vmatmul.mubr.msk.f32.vlgmr.msra.gmra.mrb[0].mxu0 %vm320_vm0, %v7888_v6  ;;  %v2041_v9 = vpop.permute.xlu0 %2040  ;;  %v2202_v12 = vpop.permute.xlu1 %2201 }
  0xcd   : > { %1897 = vmatpush1.msra.mxu0 %v1888_v7  ;;  %6716 = vmatpush3.msra.mxu1 %v7700_v4  ;;  %v7912_v4 = vld [vmem:[%s9316_s1 + $0x50] sm:$0xff]  ;;  %v2047_v16 = vsel %vm2046_vm12, %v2041_v9, %v2043_v2 }
  0xce   : > { %6717 = vmatprep.mubr.msk.f32.mxu1 %vm7586_vm11, %v7560_v0  ;;  %6720 = vmatprep.subr.mxu1 %v7560_v0  ;;  %v298_v2 = vld [vmem:[%s9316_s1 + $0x90] sm:$0xff] }
  0xcf   : > { %1960 = vmatprep.mubr.f32.mxu0 %v7560_v0  ;;  %2055 = vmatprep.subr.mxu0 %v2048_v10  ;;  %v299_v10 = vld [vmem:[%s9316_s1 + $0x98] sm:$0xff] }
  0xd0   : > { %6718 = vmatmul.mubr.msk.f32.vlgmr.msra.gmra.mrb[4].mxu1 %vm320_vm0, %v7697_v3  ;;  %v7904_v14 = vpop.permute.xlu0 %2203  ;;  %v2200_v15 = vpop.permute.xlu1 %2199 }
  0xd1   : > { %6721 = vmatpush3.msra.mxu1 %v7768_v8  ;;  %6722 = vmatprep.mubr.msk.f32.mxu1 %vm7586_vm11, %v7560_v0  ;;  %v2207_v3 = vsel %vm2205_vm13, %v2202_v12, %v7904_v14  ;;  %v2206_v21 = vsel %vm2205_vm13, %v2200_v15, %v2202_v12 }
  0xd2   : > { %6725 = vmatprep.subr.mxu1 %v7560_v0 }
  0xd4   : > { %6723 = vmatmul.mubr.msk.f32.vlgmr.msra.gmra.mrb[6].mxu1 %vm320_vm0, %v7774_v11  ;;  %5980 = vmatmul.mubr.msk.f32.vlgmr.msra.gmra.mrb[0].mxu0 %vm320_vm0, %v7912_v4  ;;  %v2361_v8 = vpop.permute.xlu0 %2360  ;;  %v7922_v17 = vpop.permute.xlu1 %2362 }
  0xd5   : > { %6726 = vmatpush3.msra.mxu1 %v7778_v13  ;;  %6727 = vmatprep.mubr.msk.f32.mxu1 %vm7586_vm11, %v7560_v0  ;;  %v7937_v13 = vld [vmem:[%s9316_s1 + $0x58] sm:$0xff] }
  0xd6   : > { %6730 = vmatprep.subr.mxu1 %v7560_v0  ;;  %2056 = vmatpush1.msra.mxu0 %v2047_v16 }
  0xd7   : > { %2119 = vmatprep.mubr.f32.mxu0 %v7560_v0  ;;  %2214 = vmatprep.subr.mxu0 %v2207_v3 }
  0xd8   : > { %6728 = vmatmul.mubr.msk.f32.vlgmr.msra.gmra.mrb[8].mxu1 %vm320_vm0, %v7791_v19  ;;  %v2359_v11 = vpop.permute.xlu0 %2358  ;;  %v2520_v20 = vpop.permute.xlu1 %2519 }
  0xd9   : > { %6731 = vmatpush3.msra.mxu1 %v7786_v18  ;;  %6732 = vmatprep.mubr.msk.f32.mxu1 %vm7586_vm11, %v7560_v0  ;;  %v2366_v18 = vsel %vm2364_vm14, %v2361_v8, %v7922_v17 }
  0xda   : > { %6735 = vmatprep.subr.mxu1 %v7560_v0 }
  0xdc   : > { %6733 = vmatmul.mubr.msk.f32.vlgmr.msra.gmra.mrb[10].mxu1 %vm320_vm0, %v7806_v26  ;;  %5982 = vmatmul.mubr.msk.f32.vlgmr.msra.gmra.mrb[0].mxu0 %vm320_vm0, %v7937_v13  ;;  %v7947_v19 = vpop.permute.xlu0 %2521  ;;  %v2518_v22 = vpop.permute.xlu1 %2517  ;;  %v2365_v26 = vsel %vm2364_vm14, %v2359_v11, %v2361_v8 }
  0xdd   : > { %6736 = vmatpush3.msra.mxu1 %v7801_v24  ;;  %6737 = vmatprep.mubr.msk.f32.mxu1 %vm7586_vm11, %v7560_v0  ;;  %v7964_v24 = vld [vmem:[%s9316_s1 + $0x60] sm:$0xff]  ;;  %v2525_v27 = vsel %vm2523_vm15, %v2520_v20, %v7947_v19  ;;  %v2524_v33 = vsel %vm2523_vm15, %v2518_v22, %v2520_v20 }
  0xde   : > { %6740 = vmatprep.subr.mxu1 %v7560_v0  ;;  %2215 = vmatpush1.msra.mxu0 %v2206_v21  ;;  %v302_v21 = vld [vmem:[%s9316_s1 + $0xb0] sm:$0xff] }
  0xdf   : > { %2278 = vmatprep.mubr.f32.mxu0 %v7560_v0  ;;  %2373 = vmatprep.subr.mxu0 %v2366_v18 }
  0xe0   : > { %6738 = vmatmul.mubr.msk.f32.vlgmr.msra.gmra.mrb[12].mxu1 %vm320_vm0, %v7823_v34  ;;  %v2679_v23 = vpop.permute.xlu0 %2678  ;;  %v7956_v25 = vpop.permute.xlu1 %2680 }
  0xe1   : > { %6741 = vmatpush3.msra.mxu1 %v7813_v30  ;;  %6742 = vmatprep.mubr.msk.f32.mxu1 %vm7586_vm11, %v7560_v0  ;;  %v2684_v34 = vsel %vm2682_vm1, %v2679_v23, %v7956_v25 }
  0xe2   : > { %6745 = vmatprep.subr.mxu1 %v7560_v0 }
  0xe4   : > { %6743 = vmatmul.mubr.msk.f32.vlgmr.msra.gmra.mrb[14].mxu1 %vm320_vm0, %v7842_v41  ;;  %5984 = vmatmul.mubr.msk.f32.vlgmr.msra.gmra.mrb[0].mxu0 %vm320_vm0, %v7964_v24  ;;  %v2677_v28 = vpop.permute.xlu0 %2676  ;;  %v2838_v29 = vpop.permute.xlu1 %2837 }
  0xe5   : > { %6746 = vmatpush3.msra.mxu1 %v7828_v36  ;;  %6747 = vmatprep.mubr.msk.f32.mxu1 %vm7586_vm11, %v7560_v0 }
  0xe6   : > { %6750 = vmatprep.subr.mxu1 %v7560_v0  ;;  %2374 = vmatpush1.msra.mxu0 %v2365_v26 }
  0xe7   : > { %2437 = vmatprep.mubr.f32.mxu0 %v7560_v0  ;;  %2532 = vmatprep.subr.mxu0 %v2525_v27  ;;  %v304_v27 = vld [vmem:[%s9316_s1 + $0xc0] sm:$0xff] }
  0xe8   : > { %6748 = vmatmul.mubr.msk.f32.vlgmr.msra.gmra.mrb[16].mxu1 %vm320_vm0, %v7855_v48  ;;  %v7981_v30 = vpop.permute.xlu0 %2839  ;;  %v2836_v31 = vpop.permute.xlu1 %2835 }
  0xe9   : > { %6751 = vmatpush3.msra.mxu1 %v7837_v40  ;;  %6752 = vmatprep.mubr.msk.f32.mxu1 %vm7586_vm11, %v7560_v0  ;;  %v2683_v40 = vsel %vm2682_vm1, %v2677_v28, %v2679_v23  ;;  %v2843_v41 = vsel %vm2841_vm2, %v2838_v29, %v7981_v30  ;;  %v2842_v47 = vsel %vm2841_vm2, %v2836_v31, %v2838_v29 }
  0xea   : > { %6755 = vmatprep.subr.mxu1 %v7560_v0 }
  0xec   : > { %6753 = vmatmul.mubr.msk.f32.vlgmr.msra.gmra.mrb[18].mxu1 %vm320_vm0, %v7866_v55  ;;  %5986 = vmatmul.mubr.msk.f32.vlgmr.msra.gmra.mrb[0].mxu0 %vm320_vm0, %v293_v32  ;;  %v2997_v35 = vpop.permute.xlu0 %2996  ;;  %v7996_v36 = vpop.permute.xlu1 %2998 }
  0xed   : > { %6756 = vmatpush3.msra.mxu1 %v7850_v46  ;;  %6757 = vmatprep.mubr.msk.f32.mxu1 %vm7586_vm11, %v7560_v0  ;;  %v295_v46 = vld [vmem:[%s9316_s1 + $0x78] sm:$0xff]  ;;  %v3002_v48 = vsel %vm3000_vm3, %v2997_v35, %v7996_v36 }
  0xee   : > { %6760 = vmatprep.subr.mxu1 %v7560_v0  ;;  %2533 = vmatpush1.msra.mxu0 %v2524_v33 }
  0xef   : > { %2596 = vmatprep.mubr.f32.mxu0 %v7560_v0  ;;  %2691 = vmatprep.subr.mxu0 %v2684_v34 }
  0xf0   : > { %6758 = vmatmul.mubr.msk.f32.vlgmr.msra.gmra.mrb[20].mxu1 %vm320_vm0, %v7888_v6  ;;  %v2995_v37 = vpop.permute.xlu0 %2994  ;;  %v8005_v38 = vpop.permute.xlu1 %3155 }
  0xf1   : > { %6761 = vmatpush3.msra.mxu1 %v7860_v52  ;;  %6762 = vmatprep.mubr.msk.f32.mxu1 %vm7586_vm11, %v7560_v0  ;;  %v3001_v54 = vsel %vm3000_vm3, %v2995_v37, %v2997_v35  ;;  %v4328_v37 = vld [vmem:[%s9318_s3 + $0x108] sm:$0xff] }
  0xf2   : > { %6765 = vmatprep.subr.mxu1 %v7560_v0 }
  0xf4   : > { %6763 = vmatmul.mubr.msk.f32.vlgmr.msra.gmra.mrb[22].mxu1 %vm320_vm0, %v7912_v4  ;;  %5988 = vmatmul.mubr.msk.f32.vlgmr.msra.gmra.mrb[0].mxu0 %vm320_vm0, %v294_v39  ;;  %v8020_v42 = vpop.permute.xlu0 %3157  ;;  %v3154_v43 = vpop.permute.xlu1 %3153  ;;  %v300_v4 = vld [vmem:[%s9316_s1 + $0xa0] sm:$0xff] }
  0xf5   : > { %6766 = vmatpush3.msra.mxu1 %v7881_v5  ;;  %6767 = vmatprep.mubr.msk.f32.mxu1 %vm7586_vm11, %v7560_v0  ;;  %v3161_v55 = vsel %vm3159_vm4, %v8005_v38, %v8020_v42  ;;  %v3160_v61 = vsel %vm3159_vm4, %v3154_v43, %v8005_v38  ;;  %v7587_v38 = vmov 0.0|0.0   ;;  %v4331_v43 = vld [vmem:[%s9318_s3 + $0x120] sm:$0xff] }
  0xf6   : > { %6770 = vmatprep.subr.mxu1 %v7560_v0  ;;  %2692 = vmatpush1.msra.mxu0 %v2683_v40  ;;  %v4329_v40 = vld [vmem:[%s9318_s3 + $0x110] sm:$0xff] }
  0xf7   : > { %2755 = vmatprep.mubr.f32.mxu0 %v7560_v0  ;;  %2850 = vmatprep.subr.mxu0 %v2843_v41  ;;  %v4330_v41 = vld [vmem:[%s9318_s3 + $0x118] sm:$0xff] }
  0xf8   : > { %6768 = vmatmul.mubr.msk.f32.vlgmr.msra.gmra.mrb[24].mxu1 %vm320_vm0, %v7937_v13  ;;  %v8029_v44 = vpop.permute.xlu0 %3314  ;;  %v8031_v45 = vpop.permute.xlu1 %3316 }
  0xf9   : > { %6771 = vmatpush3.msra.mxu1 %v7904_v14  ;;  %6772 = vmatprep.mubr.msk.f32.mxu1 %vm7586_vm11, %v7560_v0  ;;  %v3320_v62 = vsel %vm3318_vm5, %v8029_v44, %v8031_v45 }
  0xfa   : > { %6775 = vmatprep.subr.mxu1 %v7560_v0 }
  0xfc   : > { %6773 = vmatmul.mubr.msk.f32.vlgmr.msra.gmra.mrb[26].mxu1 %vm320_vm0, %v7964_v24  ;;  %5990 = vmatmul.mubr.msk.f32.vlgmr.msra.gmra.mrb[0].mxu0 %vm320_vm0, %v295_v46  ;;  %v3313_v49 = vpop.permute.xlu0 %3312  ;;  %v8046_v50 = vpop.permute.xlu1 %3474  ;;  %v303_v24 = vld [vmem:[%s9316_s1 + $0xb8] sm:$0xff] }
  0xfd   : > { %6776 = vmatpush3.msra.mxu1 %v7922_v17  ;;  %6777 = vmatprep.mubr.msk.f32.mxu1 %vm7586_vm11, %v7560_v0  ;;  %v3319_v7 = vsel %vm3318_vm5, %v3313_v49, %v8029_v44  ;;  %v301_v17 = vld [vmem:[%s9316_s1 + $0xa8] sm:$0xff]  ;;  %v4295_v49 = vld [vmem:[%s9318_s3] sm:$0xff] }
  0xfe   : > { %6780 = vmatprep.subr.mxu1 %v7560_v0  ;;  %2851 = vmatpush1.msra.mxu0 %v2842_v47  ;;  %v4332_v44 = vld [vmem:[%s9318_s3 + $0x128] sm:$0xff] }
  0xff   : > { %2914 = vmatprep.mubr.f32.mxu0 %v7560_v0  ;;  %3009 = vmatprep.subr.mxu0 %v3002_v48  ;;  %v4312_v47 = vld [vmem:[%s9318_s3 + $0x88] sm:$0xff] }
 0x100   : > { %6778 = vmatmul.mubr.msk.f32.vlgmr.msra.gmra.mrb[28].mxu1 %vm320_vm0, %v293_v32  ;;  %v3477_v51 = vpop.permute.xlu0 %3476  ;;  %v8054_v52 = vpop.permute.xlu1 %3472 }
 0x101   : > { %6781 = vmatpush3.msra.mxu1 %v7947_v19  ;;  %6782 = vmatprep.mubr.msk.f32.mxu1 %vm7586_vm11, %v7560_v0  ;;  %v3482_v9 = vsel %vm3480_vm6, %v8046_v50, %v3477_v51  ;;  %v3481_v3 = vsel %vm3480_vm6, %v8054_v52, %v8046_v50  ;;  %v4296_v50 = vld [vmem:[%s9318_s3 + $0x8] sm:$0xff]  ;;  %v4333_v52 = vld [vmem:[%s9318_s3 + $0x130] sm:$0xff] }
 0x102   : > { %6785 = vmatprep.subr.mxu1 %v7560_v0 }
 0x104   : > { %6783 = vmatmul.mubr.msk.f32.vlgmr.msra.gmra.mrb[30].mxu1 %vm320_vm0, %v294_v39  ;;  %5992 = vmatmul.mubr.msk.f32.vlgmr.msra.gmra.mrb[0].mxu0 %vm320_vm0, %v296_v53  ;;  %v3479_v56 = vpop.permute.xlu0 %3478 }
 0x105   : > { %6786 = vmatpush3.msra.mxu1 %v7956_v25  ;;  %6787 = vmatprep.mubr.msk.f32.mxu1 %vm7586_vm11, %v7560_v0  ;;  %v8072_v57 = vpop.permute.xlu1 %3636  ;;  %v3483_v12 = vsel %vm3480_vm6, %v3477_v51, %v3479_v56  ;;  %v7000_v51 = vpack.c.bf16 %v4296_v50, %v4295_v49  ;;  %v4314_v56 = vld [vmem:[%s9318_s3 + $0x98] sm:$0xff] }
 0x106   : > { %6790 = vmatprep.subr.mxu1 %v7560_v0  ;;  %3010 = vmatpush1.msra.mxu0 %v3001_v54 }
 0x107   : > { %3073 = vmatprep.mubr.f32.mxu0 %v7560_v0  ;;  %3168 = vmatprep.subr.mxu0 %v3161_v55  ;;  %v4313_v55 = vld [vmem:[%s9318_s3 + $0x90] sm:$0xff] }
 0x108   : > { %6788 = vmatmul.mubr.msk.f32.vlgmr.msra.gmra.mrb[32].mxu1 %vm320_vm0, %v295_v46  ;;  %v3639_v58 = vpop.permute.xlu0 %3638  ;;  %v4311_v46 = vld [vmem:[%s9318_s3 + $0x80] sm:$0xff] }
 0x109   : > { %6791 = vmatpush3.msra.mxu1 %v7981_v30  ;;  %6792 = vmatprep.mubr.msk.f32.mxu1 %vm7586_vm11, %v7560_v0  ;;  %v8083_v60 = vpop.permute.xlu1 %3634  ;;  %v3644_v8 = vsel %vm3642_vm7, %v8072_v57, %v3639_v58  ;;  %v6998_v48 = vpack.c.bf16 %v4312_v47, %v4311_v46 }
 0x10a   : > { %6795 = vmatprep.subr.mxu1 %v7560_v0  ;;  %v3643_v23 = vsel %vm3642_vm7, %v8083_v60, %v8072_v57  ;;  %v7002_v57 = vpack.c.bf16 %v4314_v56, %v4313_v55 }
 0x10c   : > { %6793 = vmatmul.mubr.msk.f32.vlgmr.msra.gmra.mrb[34].mxu1 %vm320_vm0, %v296_v53  ;;  %5994 = vmatmul.mubr.msk.f32.vlgmr.msra.gmra.mrb[0].mxu0 %vm320_vm0, %v297_v59  ;;  %v3641_v63 = vpop.permute.xlu0 %3640  ;;  %v4334_v53 = vld [vmem:[%s9318_s3 + $0x138] sm:$0xff] }
 0x10d   : > { %6796 = vmatpush3.msra.mxu1 %v7996_v36  ;;  %6797 = vmatprep.mubr.msk.f32.mxu1 %vm7586_vm11, %v7560_v0  ;;  %v8096_v1 = vpop.permute.xlu1 %3798  ;;  %v3645_v16 = vsel %vm3642_vm7, %v3639_v58, %v3641_v63  ;;  %v4327_v36 = vld [vmem:[%s9318_s3 + $0x100] sm:$0xff]  ;;  %v7040_v54 = vpack.c.bf16 %v4334_v53, %v4333_v52  ;;  %v4297_v58 = vld [vmem:[%s9318_s3 + $0x10] sm:$0xff] }
 0x10e   : > { %3169 = vmatpush1.msra.mxu0 %v3160_v61  ;;  %6800 = vmatprep.subr.mxu1 %v7560_v0  ;;  %v7031_v39 = vpack.c.bf16 %v4328_v37, %v4327_v36  ;;  %v6027_v61 = vld [vmem:[%s9318_s3 + $0x1c0] sm:$0xff] }
 0x10f   : > { %3232 = vmatprep.mubr.f32.mxu0 %v7560_v0  ;;  %3327 = vmatprep.subr.mxu0 %v3320_v62  ;;  %v6028_v62 = vld [vmem:[%s9318_s3 + $0x1c8] sm:$0xff] }
 0x110   : > { %6798 = vmatmul.mubr.msk.f32.vlgmr.msra.gmra.mrb[36].mxu1 %vm320_vm0, %v297_v59  ;;  %v3801_v5 = vpop.permute.xlu0 %3800  ;;  %v4298_v59 = vld [vmem:[%s9318_s3 + $0x18] sm:$0xff]  ;;  %v7042_v63 = vpack.c.bf16 %v6028_v62, %v6027_v61 }
 0x111   : > { %6801 = vmatpush3.msra.mxu1 %v8020_v42  ;;  %6802 = vmatprep.mubr.msk.f32.mxu1 %vm7586_vm11, %v7560_v0  ;;  %v3803_v6 = vpop.permute.xlu1 %3802  ;;  %v3806_v25 = vsel %vm3804_vm8, %v8096_v1, %v3801_v5  ;;  %v7034_v42 = vpack.c.bf16 %v4330_v41, %v4329_v40  ;;  %v7004_v60 = vpack.c.bf16 %v4298_v59, %v4297_v58  ;;  %v6068_v40 = vld [vmem:[%s9318_s3 + $0x300] sm:$0xff]  ;;  %v6069_v41 = vld [vmem:[%s9318_s3 + $0x308] sm:$0xff] }
 0x112   : > { %6805 = vmatprep.subr.mxu1 %v7560_v0  ;;  %v3807_v13 = vsel %vm3804_vm8, %v3801_v5, %v3803_v6  ;;  %v4299_v6 = vld [vmem:[%s9318_s3 + $0x20] sm:$0xff] }
 0x114   : > { %5996 = vmatmul.mubr.msk.f32.vlgmr.msra.gmra.mrb[0].mxu0 %vm320_vm0, %v298_v2  ;;  %6803 = vmatmul.mubr.msk.f32.vlgmr.msra.gmra.mrb[38].mxu1 %vm320_vm0, %v298_v2  ;;  %v3797_v14 = vpop.permute.xlu0 %3796  ;;  %v4316_v2 = vld [vmem:[%s9318_s3 + $0xa8] sm:$0xff] }
 0x115   : > { %3328 = vmatpush1.msra.mxu0 %v3319_v7  ;;  %6806 = vmatpush3.msra.mxu1 %v8031_v45  ;;  %v3963_v15 = vpop.permute.xlu1 %3962  ;;  %v3805_v29 = vsel %vm3804_vm8, %v3797_v14, %v8096_v1  ;;  %v7037_v45 = vpack.c.bf16 %v4332_v44, %v4331_v43  ;;  %v4315_v1 = vld [vmem:[%s9318_s3 + $0xa0] sm:$0xff]  ;;  %v4300_v7 = vld [vmem:[%s9318_s3 + $0x28] sm:$0xff] }
 0x116   : > { %6807 = vmatprep.mubr.msk.f32.mxu1 %vm7586_vm11, %v7560_v0  ;;  %6810 = vmatprep.subr.mxu1 %v7560_v0  ;;  %v7006_v5 = vpack.c.bf16 %v4316_v2, %v4315_v1 }
 0x117   : > { %3391 = vmatprep.mubr.f32.mxu0 %v7560_v0  ;;  %3490 = vmatprep.subr.mxu0 %v3482_v9  ;;  %v7008_v9 = vpack.c.bf16 %v4300_v7, %v4299_v6 }
 0x118   : > { %6808 = vmatmul.mubr.msk.f32.vlgmr.msra.gmra.mrb[40].mxu1 %vm320_vm0, %v299_v10  ;;  %v3965_v11 = vpop.permute.xlu0 %3964 }
 0x119   : > { %6811 = vmatpush3.msra.mxu1 %v3483_v12  ;;  %6812 = vmatprep.mubr.msk.f32.mxu1 %vm7586_vm11, %v7560_v0  ;;  %v3961_v20 = vpop.permute.xlu1 %3960  ;;  %v3969_v18 = vsel %vm3966_vm9, %v3963_v15, %v3965_v11  ;;  %v4318_v12 = vld [vmem:[%s9318_s3 + $0xb8] sm:$0xff]  ;;  %v4303_v11 = vld [vmem:[%s9318_s3 + $0x40] sm:$0xff] }
 0x11a   : > { %6815 = vmatprep.subr.mxu1 %v7560_v0  ;;  %v3968_v28 = vsel %vm3966_vm9, %v3961_v20, %v3963_v15  ;;  %v4301_v15 = vld [vmem:[%s9318_s3 + $0x30] sm:$0xff] }
 0x11c   : > { %5998 = vmatmul.mubr.msk.f32.vlgmr.msra.gmra.mrb[0].mxu0 %vm320_vm0, %v299_v10  ;;  %6813 = vmatmul.mubr.msk.f32.vlgmr.msra.gmra.mrb[42].mxu1 %vm320_vm0, %v300_v4  ;;  %v4125_v19 = vpop.permute.xlu0 %4124  ;;  %v4317_v10 = vld [vmem:[%s9318_s3 + $0xb0] sm:$0xff] }
 0x11d   : > { %3491 = vmatpush1.msra.mxu0 %v3481_v3  ;;  %6816 = vmatpush3.msra.mxu1 %v3645_v16  ;;  %v4127_v22 = vpop.permute.xlu1 %4126  ;;  %v7010_v14 = vpack.c.bf16 %v4318_v12, %v4317_v10  ;;  %v4319_v3 = vld [vmem:[%s9318_s3 + $0xc0] sm:$0xff] }
 0x11e   : > { %6817 = vmatprep.mubr.msk.f32.mxu1 %vm7586_vm11, %v7560_v0  ;;  %6820 = vmatprep.subr.mxu1 %v7560_v0  ;;  %v4131_v26 = vsel %vm4128_vm10, %v4125_v19, %v4127_v22  ;;  %v4305_v22 = vld [vmem:[%s9318_s3 + $0x50] sm:$0xff] }
 0x11f   : > { %3554 = vmatprep.mubr.f32.mxu0 %v7560_v0  ;;  %3652 = vmatprep.subr.mxu0 %v3644_v8  ;;  %v4320_v8 = vld [vmem:[%s9318_s3 + $0xc8] sm:$0xff] }
 0x120   : > { %6818 = vmatmul.mubr.msk.f32.vlgmr.msra.gmra.mrb[44].mxu1 %vm320_vm0, %v301_v17  ;;  %v3959_v30 = vpop.permute.xlu0 %3958 }
 0x121   : > { %6821 = vmatpush3.msra.mxu1 %v3807_v13  ;;  %6822 = vmatprep.mubr.msk.f32.mxu1 %vm7586_vm11, %v7560_v0  ;;  %v4123_v31 = vpop.permute.xlu1 %4122  ;;  %v3967_v32 = vsel %vm3966_vm9, %v3959_v30, %v3961_v20  ;;  %v4304_v20 = vld [vmem:[%s9318_s3 + $0x48] sm:$0xff] }
 0x122   : > { %6825 = vmatprep.subr.mxu1 %v7560_v0  ;;  %v4130_v33 = vsel %vm4128_vm10, %v4123_v31, %v4125_v19  ;;  %v7016_v13 = vpack.c.bf16 %v4304_v20, %v4303_v11 }
 0x124   : > { %6000 = vmatmul.mubr.msk.f32.vlgmr.msra.gmra.mrb[0].mxu0 %vm320_vm0, %v300_v4  ;;  %6823 = vmatmul.mubr.msk.f32.vlgmr.msra.gmra.mrb[46].mxu1 %vm320_vm0, %v302_v21  ;;  %v4121_v34 = vpop.permute.xlu0 %4120  ;;  %v4302_v4 = vld [vmem:[%s9318_s3 + $0x38] sm:$0xff] }
 0x125   : > { %3653 = vmatpush1.msra.mxu0 %v3643_v23  ;;  %6826 = vmatpush3.msra.mxu1 %v3969_v18  ;;  %v4129_v35 = vsel %vm4128_vm10, %v4121_v34, %v4123_v31  ;;  %v7012_v16 = vpack.c.bf16 %v4302_v4, %v4301_v15  ;;  %v4322_v18 = vld [vmem:[%s9318_s3 + $0xd8] sm:$0xff]  ;;  %v4325_v31 = vld [vmem:[%s9318_s3 + $0xf0] sm:$0xff] }
 0x126   : > { %6827 = vmatprep.mubr.msk.f32.mxu1 %vm7586_vm11, %v7560_v0  ;;  %6830 = vmatprep.subr.mxu1 %v7560_v0  ;;  %v4306_v23 = vld [vmem:[%s9318_s3 + $0x58] sm:$0xff]  ;;  %v4309_v34 = vld [vmem:[%s9318_s3 + $0x70] sm:$0xff] }
 0x127   : > { %3716 = vmatprep.mubr.f32.mxu0 %v7560_v0  ;;  %3814 = vmatprep.subr.mxu0 %v3806_v25  ;;  %v7020_v25 = vpack.c.bf16 %v4306_v23, %v4305_v22 }
 0x128   : > { %6828 = vmatmul.mubr.msk.f32.vlgmr.msra.gmra.mrb[48].mxu1 %vm320_vm0, %v303_v24 }
 0x129   : > { %6831 = vmatpush3.msra.mxu1 %v4131_v26  ;;  %6832 = vmatprep.mubr.msk.f32.mxu1 %vm7586_vm11, %v7560_v0  ;;  %v4324_v26 = vld [vmem:[%s9318_s3 + $0xe8] sm:$0xff] }
 0x12a   : > { %7030 = vmatprep.subr.bf16.mxu1 %v7587_v38 }
 0x12c   : > { %6002 = vmatmul.mubr.msk.f32.vlgmr.msra.gmra.mrb[0].mxu0 %vm320_vm0, %v301_v17  ;;  %6833 = vmatmul.mubr.msk.f32.vlgmr.msra.gmra.mrb[50].mxu1 %vm320_vm0, %v304_v27  ;;  %v7014_v17 = vpack.c.bf16 %v4320_v8, %v4319_v3 }
 0x12d   : > { %3815 = vmatpush1.msra.mxu0 %v3805_v29  ;;  %3878 = vmatprep.mubr.f32.mxu0 %v7560_v0  ;;  %v4308_v29 = vld [vmem:[%s9318_s3 + $0x68] sm:$0xff] }
 0x12e   : > { %3976 = vmatprep.subr.mxu0 %v3968_v28  ;;  %6851 = vmatprep.mubr.msk.f32.mxu1 %vm7586_vm11, %v7560_v0  ;;  %v4307_v28 = vld [vmem:[%s9318_s3 + $0x60] sm:$0xff] }
 0x12f   : > { %7032 = vmatpush3.bf16.msra.mxu1 %v7031_v39  ;;  %v7024_v30 = vpack.c.bf16 %v4308_v29, %v4307_v28 }
 0x130   : > { %7033 = vmatprep.subr.bf16.mxu1 %v7587_v38 }
 0x133   : > { %7035 = vmatpush3.bf16.msra.mxu1 %v7034_v42  ;;  %v7086_v42 = vpack.c.bf16 %v6069_v41, %v6068_v40 }
 0x134   : > { %6004 = vmatmul.mubr.msk.f32.vlgmr.msra.gmra.mrb[0].mxu0 %vm320_vm0, %v302_v21  ;;  %7036 = vmatprep.subr.bf16.mxu1 %v7587_v38  ;;  %v4321_v21 = vld [vmem:[%s9318_s3 + $0xd0] sm:$0xff] }
 0x135   : > { %3977 = vmatpush1.msra.mxu0 %v3967_v32  ;;  %4040 = vmatprep.mubr.f32.mxu0 %v7560_v0  ;;  %v7018_v19 = vpack.c.bf16 %v4322_v18, %v4321_v21  ;;  %v4326_v32 = vld [vmem:[%s9318_s3 + $0xf8] sm:$0xff] }
 0x136   : > { %4138 = vmatprep.subr.mxu0 %v4130_v33  ;;  %v7026_v33 = vpack.c.bf16 %v4326_v32, %v4325_v31 }
 0x137   : > { %7038 = vmatpush3.bf16.msra.mxu1 %v7037_v45 }
 0x138   : > { %7039 = vmatprep.subr.bf16.mxu1 %v7587_v38 }
 0x13b   : > { %7041 = vmatpush3.bf16.msra.mxu1 %v7040_v54 }
 0x13c   : > { %6006 = vmatmul.mubr.msk.f32.vlgmr.msra.gmra.mrb[0].mxu0 %vm320_vm0, %v303_v24  ;;  %7043 = vmatprep.subr.bf16.mxu1 %v7042_v63  ;;  %v4323_v24 = vld [vmem:[%s9318_s3 + $0xe0] sm:$0xff] }
 0x13d   : > { %4139 = vmatpush1.msra.mxu0 %v4129_v35  ;;  %4202 = vmatprep.mubr.f32.mxu0 %v7560_v0  ;;  %v4310_v35 = vld [vmem:[%s9318_s3 + $0x78] sm:$0xff] }
 0x13e   : > { %6999 = vmatprep.subr.bf16.mxu0 %v6998_v48  ;;  %v7028_v37 = vpack.c.bf16 %v4310_v35, %v4309_v34 }
 0x144   : > { %6008 = vmatmul.mubr.msk.f32.vlgmr.msra.gmra.mrb[0].mxu0 %vm320_vm0, %v304_v27  ;;  %v7022_v27 = vpack.c.bf16 %v4324_v26, %v4323_v24  ;;  %vm5810_vm0 = vcmask 261120  }
 0x145   : > { %7001 = vmatpush3.bf16.msra.mxu0 %v7000_v51 }
 0x146   : > { %7003 = vmatprep.subr.bf16.mxu0 %v7002_v57 }
 0x149   : > { %7005 = vmatpush3.bf16.msra.mxu0 %v7004_v60 }
 0x14a   : > { %7007 = vmatprep.subr.bf16.mxu0 %v7006_v5 }
 0x14d   : > { %7009 = vmatpush3.bf16.msra.mxu0 %v7008_v9 }
 0x14e   : > { %7011 = vmatprep.subr.bf16.mxu0 %v7010_v14 }
 0x151   : > { %7013 = vmatpush3.bf16.msra.mxu0 %v7012_v16 }
 0x152   : > { %7015 = vmatprep.subr.bf16.mxu0 %v7014_v17 }
 0x155   : > { %7017 = vmatpush3.bf16.msra.mxu0 %v7016_v13 }
 0x156   : > { %7019 = vmatprep.subr.bf16.mxu0 %v7018_v19 }
 0x159   : > { %7021 = vmatpush3.bf16.msra.mxu0 %v7020_v25 }
 0x15a   : > { %7023 = vmatprep.subr.bf16.mxu0 %v7022_v27 }
 0x15d   : > { %7025 = vmatpush3.bf16.msra.mxu0 %v7024_v30 }
 0x15e   : > { %7027 = vmatprep.subr.bf16.mxu0 %v7026_v33 }
 0x161   : > { %7029 = vmatpush3.bf16.msra.mxu0 %v7028_v37 }
 0x162   : > { %7087 = vmatprep.subr.bf16.mxu0 %v7086_v42 }
 0x19b   : > { %v8321_v36 = vpop.f32.mrb[0].mxu1 }
 0x19c   : > { %v8323_v39 = vpop.f32.mrb[1].mxu1 }
 0x19f   : > { %v461_v43 = vpop.f32.mrb[2].mxu1 }
 0x1a0   : > { %v6714_v44 = vpop.f32.mrb[3].mxu1 }
 0x1a3   : > { %v605_v45 = vpop.f32.mrb[4].mxu1 }
 0x1a4   : > { %v606_v46 = vadd.f32 %v605_v45, %v461_v43  ;;  %v6719_v47 = vpop.f32.mrb[5].mxu1 }
 0x1a7   : > { %v761_v48 = vpop.f32.mrb[6].mxu1 }
 0x1a8   : > { %v767_v49 = vadd.f32 %v761_v48, %v606_v46  ;;  %v6724_v50 = vpop.f32.mrb[7].mxu1 }
 0x1ab   : > { %v920_v51 = vpop.f32.mrb[8].mxu1 }
 0x1ac   : > { %v926_v52 = vadd.f32 %v920_v51, %v767_v49  ;;  %v6729_v53 = vpop.f32.mrb[9].mxu1 }
 0x1af   : > { %v1079_v54 = vpop.f32.mrb[10].mxu1 }
 0x1b0   : > { %v1085_v55 = vadd.f32 %v1079_v54, %v926_v52  ;;  %v6734_v56 = vpop.f32.mrb[11].mxu1 }
 0x1b3   : > { %v1238_v57 = vpop.f32.mrb[12].mxu1 }
 0x1b4   : > { %v1244_v58 = vadd.f32 %v1238_v57, %v1085_v55  ;;  %v6739_v59 = vpop.f32.mrb[13].mxu1  ;;  %v8331_v55 = vpop.permute.xlu1 %4285  ;;  %v6011_v57 = vld [vmem:[%s9318_s3 + $0x140] sm:$0xff] }
 0x1b7   : > { %v1397_v60 = vpop.f32.mrb[14].mxu1 }
 0x1b8   : > { %v1403_v61 = vadd.f32 %v1397_v60, %v1244_v58  ;;  %v6744_v62 = vpop.f32.mrb[15].mxu1  ;;  %v6012_v58 = vld [vmem:[%s9318_s3 + $0x148] sm:$0xff]  ;;  %v6029_v60 = vld [vmem:[%s9318_s3 + $0x1d0] sm:$0xff] }
 0x1bb   : > { %v1556_v63 = vpop.f32.mrb[16].mxu1 }
 0x1bc   : > { %v1562_v1 = vadd.f32 %v1556_v63, %v1403_v61  ;;  %v6749_v2 = vpop.f32.mrb[17].mxu1  ;;  %v6030_v61 = vld [vmem:[%s9318_s3 + $0x1d8] sm:$0xff]  ;;  %v7044_v63 = vpack.c.bf16 %v6012_v58, %v6011_v57 }
 0x1bd   : > { %v7046_v2 = vpack.c.bf16 %v6030_v61, %v6029_v60  ;;  %v6055_v57 = vld [vmem:[%s9318_s3 + $0x298] sm:$0xff]  ;;  %v6072_v61 = vld [vmem:[%s9318_s3 + $0x320] sm:$0xff] }
 0x1bf   : > { %v1715_v5 = vpop.f32.mrb[18].mxu1 }
 0x1c0   : > { %v1721_v6 = vadd.f32 %v1715_v5, %v1562_v1  ;;  %v6754_v7 = vpop.f32.mrb[19].mxu1  ;;  %v6013_v5 = vld [vmem:[%s9318_s3 + $0x150] sm:$0xff] }
 0x1c1   : > { %v6031_v7 = vld [vmem:[%s9318_s3 + $0x1e0] sm:$0xff] }
 0x1c3   : > { %v1874_v9 = vpop.f32.mrb[20].mxu1 }
 0x1c4   : > { %v1880_v10 = vadd.f32 %v1874_v9, %v1721_v6  ;;  %v6759_v12 = vpop.f32.mrb[21].mxu1  ;;  %v6014_v6 = vld [vmem:[%s9318_s3 + $0x158] sm:$0xff]  ;;  %v6032_v9 = vld [vmem:[%s9318_s3 + $0x1e8] sm:$0xff] }
 0x1c5   : > { %v7050_v12 = vpack.c.bf16 %v6032_v9, %v6031_v7  ;;  %v6056_v7 = vld [vmem:[%s9318_s3 + $0x2a0] sm:$0xff]  ;;  %v6057_v9 = vld [vmem:[%s9318_s3 + $0x2a8] sm:$0xff] }
 0x1c7   : > { %v2033_v14 = vpop.f32.mrb[22].mxu1 }
 0x1c8   : > { %v2039_v15 = vadd.f32 %v2033_v14, %v1880_v10  ;;  %v6764_v4 = vpop.f32.mrb[23].mxu1  ;;  %v7048_v10 = vpack.c.bf16 %v6014_v6, %v6013_v5  ;;  %v6015_v14 = vld [vmem:[%s9318_s3 + $0x160] sm:$0xff] }
 0x1c9   : > { %v6033_v4 = vld [vmem:[%s9318_s3 + $0x1f0] sm:$0xff] }
 0x1cb   : > { %v2192_v16 = vpop.f32.mrb[24].mxu1 }
 0x1cc   : > { %v2198_v3 = vadd.f32 %v2192_v16, %v2039_v15  ;;  %v6769_v8 = vpop.f32.mrb[25].mxu1  ;;  %v6016_v15 = vld [vmem:[%s9318_s3 + $0x168] sm:$0xff]  ;;  %v6034_v16 = vld [vmem:[%s9318_s3 + $0x1f8] sm:$0xff] }
 0x1cd   : > { %v7054_v8 = vpack.c.bf16 %v6034_v16, %v6033_v4  ;;  %v6045_v4 = vld [vmem:[%s9318_s3 + $0x250] sm:$0xff]  ;;  %v6046_v16 = vld [vmem:[%s9318_s3 + $0x258] sm:$0xff] }
 0x1cf   : > { %v2351_v17 = vpop.f32.mrb[26].mxu1 }
 0x1d0   : > { %v2357_v11 = vadd.f32 %v2351_v17, %v2198_v3  ;;  %v6774_v20 = vpop.f32.mrb[27].mxu1  ;;  %v7052_v3 = vpack.c.bf16 %v6016_v15, %v6015_v14  ;;  %v6017_v17 = vld [vmem:[%s9318_s3 + $0x170] sm:$0xff]  ;;  %v6075_v14 = vld [vmem:[%s9318_s3 + $0x338] sm:$0xff] }
 0x1d1   : > { %v6035_v20 = vld [vmem:[%s9318_s3 + $0x200] sm:$0xff] }
 0x1d3   : > { %v2510_v13 = vpop.f32.mrb[28].mxu1 }
 0x1d4   : > { %v2516_v21 = vadd.f32 %v2510_v13, %v2357_v11  ;;  %v6779_v18 = vpop.f32.mrb[29].mxu1  ;;  %v6018_v11 = vld [vmem:[%s9318_s3 + $0x178] sm:$0xff]  ;;  %v6036_v13 = vld [vmem:[%s9318_s3 + $0x208] sm:$0xff] }
 0x1d5   : > { %v7058_v18 = vpack.c.bf16 %v6036_v13, %v6035_v20  ;;  %v7078_v20 = vpack.c.bf16 %v6046_v16, %v6045_v4  ;;  %v6076_v13 = vld [vmem:[%s9318_s3 + $0x340] sm:$0xff]  ;;  %v6095_v16 = vld [vmem:[%s9318_s3 + $0x3d0] sm:$0xff] }
 0x1d7   : > { %v2669_v19 = vpop.f32.mrb[30].mxu1 }
 0x1d8   : > { %v2675_v22 = vadd.f32 %v2669_v19, %v2516_v21  ;;  %v6784_v23 = vpop.f32.mrb[31].mxu1  ;;  %v7056_v21 = vpack.c.bf16 %v6018_v11, %v6017_v17  ;;  %v6019_v19 = vld [vmem:[%s9318_s3 + $0x180] sm:$0xff]  ;;  %v6058_v17 = vld [vmem:[%s9318_s3 + $0x2b0] sm:$0xff]  ;;  %v6059_v11 = vld [vmem:[%s9318_s3 + $0x2b8] sm:$0xff] }
 0x1d9   : > { %v6037_v23 = vld [vmem:[%s9318_s3 + $0x210] sm:$0xff] }
 0x1db   : > { %v2828_v25 = vpop.f32.mrb[32].mxu1 }
 0x1dc   : > { %v2834_v24 = vadd.f32 %v2828_v25, %v2675_v22  ;;  %v6789_v26 = vpop.f32.mrb[33].mxu1  ;;  %v6020_v22 = vld [vmem:[%s9318_s3 + $0x188] sm:$0xff]  ;;  %v6038_v25 = vld [vmem:[%s9318_s3 + $0x218] sm:$0xff] }
 0x1dd   : > { %v7062_v26 = vpack.c.bf16 %v6038_v25, %v6037_v23  ;;  %v6060_v25 = vld [vmem:[%s9318_s3 + $0x2c0] sm:$0xff] }
 0x1df   : > { %v2987_v27 = vpop.f32.mrb[34].mxu1 }
 0x1e0   : > { %v2993_v28 = vadd.f32 %v2987_v27, %v2834_v24  ;;  %v6794_v29 = vpop.f32.mrb[35].mxu1  ;;  %v7060_v24 = vpack.c.bf16 %v6020_v22, %v6019_v19  ;;  %v6021_v27 = vld [vmem:[%s9318_s3 + $0x190] sm:$0xff]  ;;  %v6048_v19 = vld [vmem:[%s9318_s3 + $0x268] sm:$0xff]  ;;  %v7100_v22 = vpack.c.bf16 %v6059_v11, %v6058_v17  ;;  %v6113_v11 = vld [vmem:[%s9318_s3 + $0x460] sm:$0xff] }
 0x1e1   : > { %v6039_v29 = vld [vmem:[%s9318_s3 + $0x220] sm:$0xff] }
 0x1e3   : > { %v3146_v30 = vpop.f32.mrb[36].mxu1 }
 0x1e4   : > { %v3152_v31 = vadd.f32 %v3146_v30, %v2993_v28  ;;  %v6799_v32 = vpop.f32.mrb[37].mxu1  ;;  %v6022_v28 = vld [vmem:[%s9318_s3 + $0x198] sm:$0xff]  ;;  %v6040_v30 = vld [vmem:[%s9318_s3 + $0x228] sm:$0xff] }
 0x1e5   : > { %v7064_v32 = vpack.c.bf16 %v6022_v28, %v6021_v27  ;;  %v6078_v27 = vld [vmem:[%s9318_s3 + $0x350] sm:$0xff]  ;;  %v6079_v28 = vld [vmem:[%s9318_s3 + $0x358] sm:$0xff] }
 0x1e7   : > { %v3305_v33 = vpop.f32.mrb[38].mxu1 }
 0x1e8   : > { %v3311_v34 = vadd.f32 %v3305_v33, %v3152_v31  ;;  %v6804_v35 = vpop.f32.mrb[39].mxu1 }
 0x1e9   : > { %v7066_v35 = vpack.c.bf16 %v6040_v30, %v6039_v29  ;;  %v6049_v29 = vld [vmem:[%s9318_s3 + $0x270] sm:$0xff]  ;;  %v6050_v30 = vld [vmem:[%s9318_s3 + $0x278] sm:$0xff] }
 0x1eb   : > { %v3464_v37 = vpop.f32.mrb[40].mxu1 }
 0x1ec   : > { %v3470_v40 = vadd.f32 %v3464_v37, %v3311_v34  ;;  %v6809_v41 = vpop.f32.mrb[41].mxu1  ;;  %v6023_v37 = vld [vmem:[%s9318_s3 + $0x1a0] sm:$0xff] }
 0x1ef   : > { %v3627_v42 = vpop.f32.mrb[42].mxu1 }
 0x1f0   : > { %v3633_v43 = vadd.f32 %v3627_v42, %v3470_v40  ;;  %v6814_v44 = vpop.f32.mrb[43].mxu1  ;;  %v6024_v40 = vld [vmem:[%s9318_s3 + $0x1a8] sm:$0xff]  ;;  %v6041_v42 = vld [vmem:[%s9318_s3 + $0x230] sm:$0xff] }
 0x1f1   : > { %v6052_v44 = vld [vmem:[%s9318_s3 + $0x280] sm:$0xff] }
 0x1f3   : > { %v3789_v45 = vpop.f32.mrb[44].mxu1 }
 0x1f4   : > { %v3795_v46 = vadd.f32 %v3789_v45, %v3633_v43  ;;  %v6819_v47 = vpop.f32.mrb[45].mxu1  ;;  %v6053_v45 = vld [vmem:[%s9318_s3 + $0x288] sm:$0xff] }
 0x1f5   : > { %v6070_v47 = vld [vmem:[%s9318_s3 + $0x310] sm:$0xff] }
 0x1f7   : > { %v3951_v48 = vpop.f32.mrb[46].mxu1 }
 0x1f8   : > { %v3957_v49 = vadd.f32 %v3951_v48, %v3795_v46  ;;  %v6824_v50 = vpop.f32.mrb[47].mxu1  ;;  %v7068_v46 = vpack.c.bf16 %v6024_v40, %v6023_v37  ;;  %v6071_v48 = vld [vmem:[%s9318_s3 + $0x318] sm:$0xff]  ;;  %v6080_v37 = vld [vmem:[%s9318_s3 + $0x360] sm:$0xff]  ;;  %v6081_v40 = vld [vmem:[%s9318_s3 + $0x368] sm:$0xff] }
 0x1f9   : > { %v6025_v50 = vld [vmem:[%s9318_s3 + $0x1b0] sm:$0xff] }
 0x1fb   : > { %v4113_v51 = vpop.f32.mrb[48].mxu1 }
 0x1fc   : > { %v4119_v52 = vadd.f32 %v4113_v51, %v3957_v49  ;;  %v6829_v53 = vpop.f32.mrb[49].mxu1  ;;  %v6026_v51 = vld [vmem:[%s9318_s3 + $0x1b8] sm:$0xff] }
 0x1fd   : > { %v7088_v53 = vpack.c.bf16 %v6053_v45, %v6052_v44  ;;  %v7072_v60 = vpack.c.bf16 %v6026_v51, %v6025_v50  ;;  %v6064_v44 = vld [vmem:[%s9318_s3 + $0x2e0] sm:$0xff]  ;;  %v6065_v45 = vld [vmem:[%s9318_s3 + $0x2e8] sm:$0xff]  ;;  %v6087_v50 = vld [vmem:[%s9318_s3 + $0x398] sm:$0xff] }
 0x1fe   : > { %v7112_v51 = vpack.c.bf16 %v6065_v45, %v6064_v44  ;;  %v6102_v44 = vld [vmem:[%s9318_s3 + $0x408] sm:$0xff] }
 0x1ff   : > { %v4275_v54 = vpop.f32.mrb[50].mxu1 }
 0x200   : > { %v4281_v56 = vadd.f32 %v4275_v54, %v4119_v52  ;;  %v6834_v59 = vpop.f32.mrb[51].mxu1 }
 0x202   : > { %v4290_v62 = vadd.f32 %v8331_v55, %v4281_v56  ;;  %v6054_v56 = vld [vmem:[%s9318_s3 + $0x290] sm:$0xff] }
 0x203   : > { %v7092_v5 = vpack.c.bf16 %v6055_v57, %v6054_v56  ;;  %v6067_v56 = vld [vmem:[%s9318_s3 + $0x2f8] sm:$0xff] }
 0x204   : > { %v8346_v1 = vmax.f32 %v4290_v62, 0.0  ;;  %v6073_v62 = vld [vmem:[%s9318_s3 + $0x328] sm:$0xff] }
 0x205   : > { %v7094_v6 = vpack.c.bf16 %v6073_v62, %v6072_v61  ;;  %v6089_v61 = vld [vmem:[%s9318_s3 + $0x3a8] sm:$0xff] }
 0x206   : > { %6852 = vmatmul.mubr.msk.f32.vlgmr.msra.gmra.mrb[52].mxu1 %vm3318_vm5, %v8346_v1 }
 0x207   : > { %7045 = vmatpush3.bf16.msra.mxu1 %v7044_v63  ;;  %v6043_v63 = vld [vmem:[%s9318_s3 + $0x240] sm:$0xff] }
 0x208   : > { %7047 = vmatprep.subr.bf16.mxu1 %v7046_v2  ;;  %v6044_v2 = vld [vmem:[%s9318_s3 + $0x248] sm:$0xff] }
 0x20b   : > { %7049 = vmatpush3.bf16.msra.mxu1 %v7048_v10  ;;  %v7075_v10 = vpack.c.bf16 %v6044_v2, %v6043_v63  ;;  %v6093_v2 = vld [vmem:[%s9318_s3 + $0x3c0] sm:$0xff] }
 0x20c   : > { %7051 = vmatprep.subr.bf16.mxu1 %v7050_v12  ;;  %v6074_v12 = vld [vmem:[%s9318_s3 + $0x330] sm:$0xff] }
 0x20f   : > { %7053 = vmatpush3.bf16.msra.mxu1 %v7052_v3  ;;  %v7096_v3 = vpack.c.bf16 %v6057_v9, %v6056_v7  ;;  %v6111_v7 = vld [vmem:[%s9318_s3 + $0x450] sm:$0xff]  ;;  %v6112_v9 = vld [vmem:[%s9318_s3 + $0x458] sm:$0xff] }
 0x210   : > { %7055 = vmatprep.subr.bf16.mxu1 %v7054_v8  ;;  %v7098_v8 = vpack.c.bf16 %v6075_v14, %v6074_v12  ;;  %v6091_v12 = vld [vmem:[%s9318_s3 + $0x3b8] sm:$0xff]  ;;  %v7134_v4 = vpack.c.bf16 %v6112_v9, %v6111_v7  ;;  %v4902_v7 = vrot.slane %v8346_v1, 3  ;;  %v6168_v9 = vld [vmem:[%s9318_s3 + $0x610] sm:$0xff] }
 0x213   : > { %7057 = vmatpush3.bf16.msra.mxu1 %v7056_v21  ;;  %v6077_v21 = vld [vmem:[%s9318_s3 + $0x348] sm:$0xff] }
 0x214   : > { %7059 = vmatprep.subr.bf16.mxu1 %v7058_v18  ;;  %v6047_v18 = vld [vmem:[%s9318_s3 + $0x260] sm:$0xff]  ;;  %v7102_v23 = vpack.c.bf16 %v6077_v21, %v6076_v13  ;;  %v6126_v21 = vld [vmem:[%s9318_s3 + $0x4c8] sm:$0xff] }
 0x215   : > { %v6125_v13 = vld [vmem:[%s9318_s3 + $0x4c0] sm:$0xff] }
 0x217   : > { %7061 = vmatpush3.bf16.msra.mxu1 %v7060_v24  ;;  %v4204_v31 = vpop.f32.mrb[0].mxu0  ;;  %v6061_v24 = vld [vmem:[%s9318_s3 + $0x2c8] sm:$0xff] }
 0x218   : > { %v7356_v33 = vadd.f32 %v4204_v31, %v8321_v36  ;;  %v4206_v34 = vpop.f32.mrb[1].mxu0  ;;  %7063 = vmatprep.subr.bf16.mxu1 %v7062_v26  ;;  %v6042_v36 = vld [vmem:[%s9318_s3 + $0x238] sm:$0xff]  ;;  %v7081_v26 = vpack.c.bf16 %v6048_v19, %v6047_v18  ;;  %v7104_v31 = vpack.c.bf16 %v6061_v24, %v6060_v25  ;;  %v7163_v25 = vpack.c.bf16 %v6126_v21, %v6125_v13  ;;  %v6115_v24 = vld [vmem:[%s9318_s3 + $0x470] sm:$0xff]  ;;  %v6134_v21 = vld [vmem:[%s9318_s3 + $0x500] sm:$0xff] }
 0x219   : > { %v7357_v41 = vadd.f32 %v4206_v34, %v8323_v39  ;;  %v7070_v49 = vpack.c.bf16 %v6042_v36, %v6041_v42  ;;  %v6063_v34 = vld [vmem:[%s9318_s3 + $0x2d8] sm:$0xff]  ;;  %v6085_v42 = vld [vmem:[%s9318_s3 + $0x388] sm:$0xff] }
 0x21a   : > { %v4288_v43 = vadd.f32 %v7356_v33, %v8331_v55  ;;  %v6062_v33 = vld [vmem:[%s9318_s3 + $0x2d0] sm:$0xff] }
 0x21b   : > { %v4289_v39 = vadd.f32 %v7357_v41, %v8331_v55  ;;  %7065 = vmatpush3.bf16.msra.mxu1 %v7064_v32  ;;  %v7090_v55 = vpack.c.bf16 %v6071_v48, %v6070_v47  ;;  %v7106_v32 = vpack.c.bf16 %v6079_v28, %v6078_v27  ;;  %v6084_v41 = vld [vmem:[%s9318_s3 + $0x380] sm:$0xff]  ;;  %v7108_v36 = vpack.c.bf16 %v6063_v34, %v6062_v33  ;;  %v6083_v47 = vld [vmem:[%s9318_s3 + $0x378] sm:$0xff]  ;;  %v6127_v28 = vld [vmem:[%s9318_s3 + $0x4d0] sm:$0xff] }
 0x21c   : > { %7067 = vmatprep.subr.bf16.mxu1 %v7066_v35  ;;  %v8446_v54 = vmax.f32 %v4288_v43, 0.0  ;;  %v7084_v35 = vpack.c.bf16 %v6050_v30, %v6049_v29  ;;  %v7110_v43 = vpack.c.bf16 %v6081_v40, %v6080_v37  ;;  %v4524_v48 = vrot.slane %v8346_v1, 1  ;;  %v6128_v29 = vld [vmem:[%s9318_s3 + $0x4d8] sm:$0xff]  ;;  %v6118_v37 = vld [vmem:[%s9318_s3 + $0x488] sm:$0xff]  ;;  %v6129_v40 = vld [vmem:[%s9318_s3 + $0x4e0] sm:$0xff] }
 0x21d   : > { %v8444_v52 = vmax.f32 %v4289_v39, 0.0  ;;  %v7119_v39 = vpack.c.bf16 %v6085_v42, %v6084_v41  ;;  %v4713_v27 = vrot.slane %v8346_v1, 2  ;;  %v6100_v33 = vld [vmem:[%s9318_s3 + $0x3f8] sm:$0xff]  ;;  %v7166_v34 = vpack.c.bf16 %v6128_v29, %v6127_v28  ;;  %v6130_v41 = vld [vmem:[%s9318_s3 + $0x4e8] sm:$0xff] }
 0x21e   : > { %v4522_v15 = vrot.slane %v8446_v54, 1  ;;  %v7169_v45 = vpack.c.bf16 %v6130_v41, %v6129_v40  ;;  %v6192_v28 = vld [vmem:[%s9318_s3 + $0x6c8] sm:$0xff]  ;;  %v4900_v29 = vrot.slane %v8446_v54, 3  ;;  %v6175_v41 = vld [vmem:[%s9318_s3 + $0x640] sm:$0xff] }
 0x21f   : > { %7069 = vmatpush3.bf16.msra.mxu1 %v7068_v46  ;;  %4402 = vmatprep.mubr.f32.mxu0 %v8444_v52  ;;  %v4523_v58 = vrot.slane %v8444_v52, 1  ;;  %v4712_v59 = vrot.slane %v8444_v52, 2  ;;  %v6082_v46 = vld [vmem:[%s9318_s3 + $0x370] sm:$0xff] }
 0x220   : > { %4403 = vmatmul.mubr.f32.vlgmr.msra.gmra.mrb[2].mxu0 %v8446_v54  ;;  %7071 = vmatprep.subr.bf16.mxu1 %v7070_v49  ;;  %v6086_v49 = vld [vmem:[%s9318_s3 + $0x390] sm:$0xff] }
 0x221   : > { %7089 = vmatpush3.bf16.msra.mxu0 %v7088_v53  ;;  %4593 = vmatprep.mubr.f32.mxu1 %v4523_v58  ;;  %v7114_v53 = vpack.c.bf16 %v6083_v47, %v6082_v46  ;;  %v7122_v57 = vpack.c.bf16 %v6087_v50, %v6086_v49  ;;  %v6109_v58 = vld [vmem:[%s9318_s3 + $0x440] sm:$0xff]  ;;  %v6120_v46 = vld [vmem:[%s9318_s3 + $0x498] sm:$0xff]  ;;  %v6131_v47 = vld [vmem:[%s9318_s3 + $0x4f0] sm:$0xff] }
 0x222   : > { %4782 = vmatprep.mubr.f32.mxu0 %v4712_v59  ;;  %7091 = vmatprep.subr.bf16.mxu0 %v7090_v55  ;;  %v6066_v55 = vld [vmem:[%s9318_s3 + $0x2f0] sm:$0xff]  ;;  %v6110_v59 = vld [vmem:[%s9318_s3 + $0x448] sm:$0xff] }
 0x223   : > { %7073 = vmatpush3.bf16.msra.mxu1 %v7072_v60  ;;  %v6088_v60 = vld [vmem:[%s9318_s3 + $0x3a0] sm:$0xff]  ;;  %v7116_v62 = vpack.c.bf16 %v6067_v56, %v6066_v55  ;;  %v7130_v63 = vpack.c.bf16 %v6110_v59, %v6109_v58  ;;  %v6167_v59 = vld [vmem:[%s9318_s3 + $0x608] sm:$0xff] }
 0x224   : > { %7074 = vmatprep.subr.bf16.mxu1 %v7587_v38  ;;  %v6121_v56 = vld [vmem:[%s9318_s3 + $0x4a0] sm:$0xff] }
 0x225   : > { %7093 = vmatpush3.bf16.msra.mxu0 %v7092_v5  ;;  %v6094_v5 = vld [vmem:[%s9318_s3 + $0x3c8] sm:$0xff]  ;;  %v6166_v58 = vld [vmem:[%s9318_s3 + $0x600] sm:$0xff] }
 0x226   : > { %4594 = vmatmul.mubr.f32.vlgmr.msra.gmra.mrb[54].mxu1 %v4522_v15  ;;  %7095 = vmatprep.subr.bf16.mxu0 %v7094_v6  ;;  %v7125_v6 = vpack.c.bf16 %v6089_v61, %v6088_v60  ;;  %v7132_v14 = vpack.c.bf16 %v6094_v5, %v6093_v2  ;;  %v4711_v15 = vrot.slane %v8446_v54, 2  ;;  %v7207_v2 = vpack.c.bf16 %v6167_v59, %v6166_v58  ;;  %v6123_v5 = vld [vmem:[%s9318_s3 + $0x4b0] sm:$0xff]  ;;  %v6195_v58 = vld [vmem:[%s9318_s3 + $0x6e0] sm:$0xff]  ;;  %v6196_v59 = vld [vmem:[%s9318_s3 + $0x6e8] sm:$0xff] }
 0x227   : > { %7076 = vmatpush3.bf16.msra.mxu1 %v7075_v10  ;;  %6870 = vmatprep.mubr.msk.f32.mxu1 %vm7586_vm11, %v7560_v0  ;;  %v6090_v10 = vld [vmem:[%s9318_s3 + $0x3b0] sm:$0xff] }
 0x228   : > { %7077 = vmatprep.subr.bf16.mxu1 %v7587_v38  ;;  %v7128_v17 = vpack.c.bf16 %v6091_v12, %v6090_v10  ;;  %v6169_v10 = vld [vmem:[%s9318_s3 + $0x618] sm:$0xff] }
 0x229   : > { %7097 = vmatpush3.bf16.msra.mxu0 %v7096_v3  ;;  %v6096_v3 = vld [vmem:[%s9318_s3 + $0x3d8] sm:$0xff] }
 0x22a   : > { %7099 = vmatprep.subr.bf16.mxu0 %v7098_v8  ;;  %v4901_v8 = vrot.slane %v8444_v52, 3  ;;  %v7136_v18 = vpack.c.bf16 %v6096_v3, %v6095_v16  ;;  %v7210_v16 = vpack.c.bf16 %v6169_v10, %v6168_v9  ;;  %v6150_v3 = vld [vmem:[%s9318_s3 + $0x580] sm:$0xff]  ;;  %v6180_v9 = vld [vmem:[%s9318_s3 + $0x668] sm:$0xff] }
 0x22b   : > { %7079 = vmatpush3.bf16.msra.mxu1 %v7078_v20  ;;  %v6114_v20 = vld [vmem:[%s9318_s3 + $0x468] sm:$0xff] }
 0x22c   : > { %7080 = vmatprep.subr.bf16.mxu1 %v7587_v38  ;;  %v7138_v19 = vpack.c.bf16 %v6114_v20, %v6113_v11  ;;  %v6171_v11 = vld [vmem:[%s9318_s3 + $0x628] sm:$0xff] }
 0x22d   : > { %7101 = vmatpush3.bf16.msra.mxu0 %v7100_v22  ;;  %v6097_v22 = vld [vmem:[%s9318_s3 + $0x3e0] sm:$0xff] }
 0x22e   : > { %7103 = vmatprep.subr.bf16.mxu0 %v7102_v23  ;;  %v6098_v23 = vld [vmem:[%s9318_s3 + $0x3e8] sm:$0xff] }
 0x22f   : > { %7082 = vmatpush3.bf16.msra.mxu1 %v7081_v26  ;;  %v6116_v26 = vld [vmem:[%s9318_s3 + $0x478] sm:$0xff]  ;;  %v7140_v30 = vpack.c.bf16 %v6098_v23, %v6097_v22  ;;  %v6152_v22 = vld [vmem:[%s9318_s3 + $0x590] sm:$0xff] }
 0x230   : > { %7083 = vmatprep.subr.bf16.mxu1 %v7587_v38  ;;  %v6153_v23 = vld [vmem:[%s9318_s3 + $0x598] sm:$0xff] }
 0x231   : > { %7105 = vmatpush3.bf16.msra.mxu0 %v7104_v31  ;;  %v7142_v31 = vpack.c.bf16 %v6116_v26, %v6115_v24  ;;  %v6173_v24 = vld [vmem:[%s9318_s3 + $0x638] sm:$0xff] }
 0x232   : > { %7107 = vmatprep.subr.bf16.mxu0 %v7106_v32  ;;  %v6099_v32 = vld [vmem:[%s9318_s3 + $0x3f0] sm:$0xff] }
 0x233   : > { %7085 = vmatpush3.bf16.msra.mxu1 %v7084_v35  ;;  %v6117_v35 = vld [vmem:[%s9318_s3 + $0x480] sm:$0xff]  ;;  %v7144_v42 = vpack.c.bf16 %v6100_v33, %v6099_v32  ;;  %v6137_v32 = vld [vmem:[%s9318_s3 + $0x518] sm:$0xff]  ;;  %v5090_v33 = vrot.slane %v8444_v52, 4 }
 0x234   : > { %7118 = vmatprep.subr.bf16.mxu1 %v7587_v38 }
 0x235   : > { %7109 = vmatpush3.bf16.msra.mxu0 %v7108_v36  ;;  %v7146_v36 = vpack.c.bf16 %v6118_v37, %v6117_v35  ;;  %v6154_v35 = vld [vmem:[%s9318_s3 + $0x5a0] sm:$0xff]  ;;  %v6155_v37 = vld [vmem:[%s9318_s3 + $0x5a8] sm:$0xff] }
 0x236   : > { %6871 = vmatmul.mubr.msk.f32.vlgmr.msra.gmra.mrb[52].mxu1 %vm3318_vm5, %v4524_v48  ;;  %7111 = vmatprep.subr.bf16.mxu0 %v7110_v43  ;;  %v6101_v43 = vld [vmem:[%s9318_s3 + $0x400] sm:$0xff]  ;;  %v6132_v48 = vld [vmem:[%s9318_s3 + $0x4f8] sm:$0xff] }
 0x237   : > { %7120 = vmatpush3.bf16.msra.mxu1 %v7119_v39  ;;  %6889 = vmatprep.mubr.msk.f32.mxu1 %vm7586_vm11, %v7560_v0  ;;  %v6119_v39 = vld [vmem:[%s9318_s3 + $0x490] sm:$0xff]  ;;  %v7148_v49 = vpack.c.bf16 %v6102_v44, %v6101_v43  ;;  %v7172_v55 = vpack.c.bf16 %v6132_v48, %v6131_v47  ;;  %v6194_v44 = vld [vmem:[%s9318_s3 + $0x6d8] sm:$0xff] }
 0x238   : > { %7121 = vmatprep.subr.bf16.mxu1 %v7587_v38  ;;  %v7150_v50 = vpack.c.bf16 %v6120_v46, %v6119_v39  ;;  %v6193_v43 = vld [vmem:[%s9318_s3 + $0x6d0] sm:$0xff]  ;;  %v6138_v39 = vld [vmem:[%s9318_s3 + $0x520] sm:$0xff]  ;;  %v6139_v46 = vld [vmem:[%s9318_s3 + $0x528] sm:$0xff] }
 0x239   : > { %7113 = vmatpush3.bf16.msra.mxu0 %v7112_v51  ;;  %v6103_v51 = vld [vmem:[%s9318_s3 + $0x410] sm:$0xff] }
 0x23a   : > { %7115 = vmatprep.subr.bf16.mxu0 %v7114_v53  ;;  %v6104_v53 = vld [vmem:[%s9318_s3 + $0x418] sm:$0xff]  ;;  %v6156_v48 = vld [vmem:[%s9318_s3 + $0x5b0] sm:$0xff] }
 0x23b   : > { %7123 = vmatpush3.bf16.msra.mxu1 %v7122_v57  ;;  %v6122_v57 = vld [vmem:[%s9318_s3 + $0x4a8] sm:$0xff]  ;;  %v7152_v60 = vpack.c.bf16 %v6104_v53, %v6103_v51  ;;  %v7222_v51 = vpack.c.bf16 %v6194_v44, %v6193_v43  ;;  %v6177_v53 = vld [vmem:[%s9318_s3 + $0x650] sm:$0xff]  ;;  %v6186_v44 = vld [vmem:[%s9318_s3 + $0x698] sm:$0xff] }
 0x23c   : > { %7124 = vmatprep.subr.bf16.mxu1 %v7587_v38  ;;  %v7154_v61 = vpack.c.bf16 %v6122_v57, %v6121_v56  ;;  %v5279_v56 = vrot.slane %v8444_v52, 5  ;;  %v7184_v57 = vpack.c.bf16 %v6139_v46, %v6138_v39  ;;  %v6185_v43 = vld [vmem:[%s9318_s3 + $0x690] sm:$0xff]  ;;  %v6203_v39 = vld [vmem:[%s9318_s3 + $0x720] sm:$0xff]  ;;  %v6204_v46 = vld [vmem:[%s9318_s3 + $0x728] sm:$0xff] }
 0x23d   : > { %7117 = vmatpush3.bf16.msra.mxu0 %v7116_v62  ;;  %v6105_v62 = vld [vmem:[%s9318_s3 + $0x420] sm:$0xff] }
 0x23e   : > { %7131 = vmatprep.subr.bf16.mxu0 %v7130_v63  ;;  %v6106_v63 = vld [vmem:[%s9318_s3 + $0x428] sm:$0xff] }
 0x23f   : > { %7126 = vmatpush3.bf16.msra.mxu1 %v7125_v6  ;;  %v6124_v6 = vld [vmem:[%s9318_s3 + $0x4b8] sm:$0xff]  ;;  %v7156_v12 = vpack.c.bf16 %v6106_v63, %v6105_v62 }
 0x240   : > { %4783 = vmatmul.mubr.f32.vlgmr.msra.gmra.mrb[4].mxu0 %v4711_v15  ;;  %7127 = vmatprep.subr.bf16.mxu1 %v7587_v38  ;;  %v6107_v15 = vld [vmem:[%s9318_s3 + $0x430] sm:$0xff]  ;;  %v6141_v62 = vld [vmem:[%s9318_s3 + $0x538] sm:$0xff] }
 0x241   : > { %7133 = vmatpush3.bf16.msra.mxu0 %v7132_v14  ;;  %4971 = vmatprep.mubr.f32.mxu0 %v4901_v8  ;;  %v7158_v14 = vpack.c.bf16 %v6124_v6, %v6123_v5  ;;  %v6151_v8 = vld [vmem:[%s9318_s3 + $0x588] sm:$0xff]  ;;  %v7226_v6 = vpack.c.bf16 %v6196_v59, %v6195_v58  ;;  %v6205_v59 = vld [vmem:[%s9318_s3 + $0x730] sm:$0xff] }
 0x242   : > { %7135 = vmatprep.subr.bf16.mxu0 %v7134_v4  ;;  %v6108_v4 = vld [vmem:[%s9318_s3 + $0x438] sm:$0xff]  ;;  %v7174_v13 = vpack.c.bf16 %v6151_v8, %v6150_v3  ;;  %v6159_v5 = vld [vmem:[%s9318_s3 + $0x5c8] sm:$0xff]  ;;  %v6160_v8 = vld [vmem:[%s9318_s3 + $0x5d0] sm:$0xff] }
 0x243   : > { %7129 = vmatpush3.bf16.msra.mxu1 %v7128_v17  ;;  %v6170_v17 = vld [vmem:[%s9318_s3 + $0x620] sm:$0xff]  ;;  %v7160_v20 = vpack.c.bf16 %v6108_v4, %v6107_v15 }
 0x244   : > { %7162 = vmatprep.subr.bf16.mxu1 %v7587_v38  ;;  %v6142_v4 = vld [vmem:[%s9318_s3 + $0x540] sm:$0xff] }
 0x245   : > { %7137 = vmatpush3.bf16.msra.mxu0 %v7136_v18  ;;  %v6135_v18 = vld [vmem:[%s9318_s3 + $0x508] sm:$0xff] }
 0x246   : > { %6890 = vmatmul.mubr.msk.f32.vlgmr.msra.gmra.mrb[52].mxu1 %vm3318_vm5, %v4713_v27  ;;  %7139 = vmatprep.subr.bf16.mxu0 %v7138_v19  ;;  %v7213_v19 = vpack.c.bf16 %v6171_v11, %v6170_v17  ;;  %v7176_v26 = vpack.c.bf16 %v6135_v18, %v6134_v21  ;;  %v6191_v27 = vld [vmem:[%s9318_s3 + $0x6c0] sm:$0xff]  ;;  %v6161_v17 = vld [vmem:[%s9318_s3 + $0x5d8] sm:$0xff] }
 0x247   : > { %7164 = vmatpush3.bf16.msra.mxu1 %v7163_v25  ;;  %6908 = vmatprep.mubr.msk.f32.mxu1 %vm7586_vm11, %v7560_v0  ;;  %v6172_v25 = vld [vmem:[%s9318_s3 + $0x630] sm:$0xff]  ;;  %v7218_v40 = vpack.c.bf16 %v6192_v28, %v6191_v27  ;;  %v6199_v18 = vld [vmem:[%s9318_s3 + $0x700] sm:$0xff]  ;;  %v6163_v27 = vld [vmem:[%s9318_s3 + $0x5e8] sm:$0xff] }
 0x248   : > { %7165 = vmatprep.subr.bf16.mxu1 %v7587_v38 }
 0x249   : > { %7141 = vmatpush3.bf16.msra.mxu0 %v7140_v30  ;;  %v7178_v30 = vpack.c.bf16 %v6153_v23, %v6152_v22  ;;  %v7194_v22 = vpack.c.bf16 %v6161_v17, %v6160_v8  ;;  %v6144_v23 = vld [vmem:[%s9318_s3 + $0x550] sm:$0xff]  ;;  %v6236_v17 = vld [vmem:[%s9318_s3 + $0x820] sm:$0xff] }
 0x24a   : > { %7143 = vmatprep.subr.bf16.mxu0 %v7142_v31  ;;  %v6136_v31 = vld [vmem:[%s9318_s3 + $0x510] sm:$0xff] }
 0x24b   : > { %7167 = vmatpush3.bf16.msra.mxu1 %v7166_v34  ;;  %v7216_v34 = vpack.c.bf16 %v6173_v24, %v6172_v25  ;;  %v6145_v25 = vld [vmem:[%s9318_s3 + $0x558] sm:$0xff] }
 0x24c   : > { %7168 = vmatprep.subr.bf16.mxu1 %v7587_v38 }
 0x24d   : > { %7145 = vmatpush3.bf16.msra.mxu0 %v7144_v42  ;;  %v6176_v42 = vld [vmem:[%s9318_s3 + $0x648] sm:$0xff] }
 0x24e   : > { %7147 = vmatprep.subr.bf16.mxu0 %v7146_v36  ;;  %v7180_v36 = vpack.c.bf16 %v6137_v32, %v6136_v31  ;;  %v7220_v47 = vpack.c.bf16 %v6176_v42, %v6175_v41  ;;  %v7196_v31 = vpack.c.bf16 %v6145_v25, %v6144_v23  ;;  %v6201_v32 = vld [vmem:[%s9318_s3 + $0x710] sm:$0xff]  ;;  %v6165_v42 = vld [vmem:[%s9318_s3 + $0x5f8] sm:$0xff] }
 0x24f   : > { %7170 = vmatpush3.bf16.msra.mxu1 %v7169_v45  ;;  %v7182_v45 = vpack.c.bf16 %v6155_v37, %v6154_v35  ;;  %v6146_v35 = vld [vmem:[%s9318_s3 + $0x560] sm:$0xff]  ;;  %v6147_v37 = vld [vmem:[%s9318_s3 + $0x568] sm:$0xff]  ;;  %v6164_v41 = vld [vmem:[%s9318_s3 + $0x5f0] sm:$0xff] }
 0x250   : > { %7171 = vmatprep.subr.bf16.mxu1 %v7587_v38  ;;  %v6238_v25 = vld [vmem:[%s9318_s3 + $0x830] sm:$0xff] }
 0x251   : > { %7149 = vmatpush3.bf16.msra.mxu0 %v7148_v49  ;;  %v6157_v49 = vld [vmem:[%s9318_s3 + $0x5b8] sm:$0xff] }
 0x252   : > { %7151 = vmatprep.subr.bf16.mxu0 %v7150_v50  ;;  %v5091_v50 = vrot.slane %v8346_v1, 4 }
 0x253   : > { %7173 = vmatpush3.bf16.msra.mxu1 %v7172_v55  ;;  %v6178_v55 = vld [vmem:[%s9318_s3 + $0x658] sm:$0xff] }
 0x254   : > { %7206 = vmatprep.subr.bf16.mxu1 %v7587_v38  ;;  %v7224_v63 = vpack.c.bf16 %v6178_v55, %v6177_v53  ;;  %v6233_v53 = vld [vmem:[%s9318_s3 + $0x808] sm:$0xff]  ;;  %v7242_v55 = vpack.c.bf16 %v6204_v46, %v6203_v39  ;;  %v6243_v39 = vld [vmem:[%s9318_s3 + $0x858] sm:$0xff]  ;;  %v6213_v46 = vld [vmem:[%s9318_s3 + $0x770] sm:$0xff] }
 0x255   : > { %7153 = vmatpush3.bf16.msra.mxu0 %v7152_v60  ;;  %v7186_v60 = vpack.c.bf16 %v6157_v49, %v6156_v48  ;;  %v6148_v48 = vld [vmem:[%s9318_s3 + $0x570] sm:$0xff]  ;;  %v6149_v49 = vld [vmem:[%s9318_s3 + $0x578] sm:$0xff] }
 0x256   : > { %6909 = vmatmul.mubr.msk.f32.vlgmr.msra.gmra.mrb[52].mxu1 %vm3318_vm5, %v4902_v7  ;;  %7155 = vmatprep.subr.bf16.mxu0 %v7154_v61  ;;  %v6140_v61 = vld [vmem:[%s9318_s3 + $0x530] sm:$0xff]  ;;  %v6179_v7 = vld [vmem:[%s9318_s3 + $0x660] sm:$0xff]  ;;  %v7204_v58 = vpack.c.bf16 %v6149_v49, %v6148_v48 }
 0x257   : > { %7208 = vmatpush3.bf16.msra.mxu1 %v7207_v2  ;;  %6927 = vmatprep.mubr.msk.f32.mxu1 %vm7586_vm11, %v7560_v0  ;;  %v6158_v2 = vld [vmem:[%s9318_s3 + $0x5c0] sm:$0xff]  ;;  %v7188_v10 = vpack.c.bf16 %v6141_v62, %v6140_v61  ;;  %v7228_v3 = vpack.c.bf16 %v6180_v9, %v6179_v7  ;;  %v6189_v9 = vld [vmem:[%s9318_s3 + $0x6b0] sm:$0xff] }
 0x258   : > { %7209 = vmatprep.subr.bf16.mxu1 %v7587_v38  ;;  %v7190_v15 = vpack.c.bf16 %v6159_v5, %v6158_v2  ;;  %v6216_v62 = vld [vmem:[%s9318_s3 + $0x780] sm:$0xff]  ;;  %v6234_v5 = vld [vmem:[%s9318_s3 + $0x810] sm:$0xff] }
 0x259   : > { %7157 = vmatpush3.bf16.msra.mxu0 %v7156_v12  ;;  %v6197_v12 = vld [vmem:[%s9318_s3 + $0x6f0] sm:$0xff] }
 0x25a   : > { %7159 = vmatprep.subr.bf16.mxu0 %v7158_v14  ;;  %v6198_v14 = vld [vmem:[%s9318_s3 + $0x6f8] sm:$0xff] }
 0x25b   : > { %7211 = vmatpush3.bf16.msra.mxu1 %v7210_v16  ;;  %v6143_v16 = vld [vmem:[%s9318_s3 + $0x548] sm:$0xff]  ;;  %v7230_v11 = vpack.c.bf16 %v6198_v14, %v6197_v12  ;;  %v5089_v14 = vrot.slane %v8446_v54, 4 }
 0x25c   : > { %7212 = vmatprep.subr.bf16.mxu1 %v7587_v38  ;;  %v7192_v21 = vpack.c.bf16 %v6143_v16, %v6142_v4  ;;  %v6218_v4 = vld [vmem:[%s9318_s3 + $0x790] sm:$0xff]  ;;  %v6219_v16 = vld [vmem:[%s9318_s3 + $0x798] sm:$0xff] }
 0x25d   : > { %7161 = vmatpush3.bf16.msra.mxu0 %v7160_v20  ;;  %v6181_v20 = vld [vmem:[%s9318_s3 + $0x670] sm:$0xff] }
 0x25e   : > { %7175 = vmatprep.subr.bf16.mxu0 %v7174_v13  ;;  %v6182_v13 = vld [vmem:[%s9318_s3 + $0x678] sm:$0xff] }
 0x25f   : > { %7214 = vmatpush3.bf16.msra.mxu1 %v7213_v19  ;;  %v6200_v19 = vld [vmem:[%s9318_s3 + $0x708] sm:$0xff]  ;;  %v7232_v24 = vpack.c.bf16 %v6182_v13, %v6181_v20  ;;  %v6207_v20 = vld [vmem:[%s9318_s3 + $0x740] sm:$0xff] }
 0x260   : > { %4972 = vmatmul.mubr.f32.vlgmr.msra.gmra.mrb[6].mxu0 %v4900_v29  ;;  %7215 = vmatprep.subr.bf16.mxu1 %v7587_v38  ;;  %v7234_v28 = vpack.c.bf16 %v6200_v19, %v6199_v18  ;;  %v6183_v29 = vld [vmem:[%s9318_s3 + $0x680] sm:$0xff]  ;;  %v6208_v13 = vld [vmem:[%s9318_s3 + $0x748] sm:$0xff] }
 0x261   : > { %7177 = vmatpush3.bf16.msra.mxu0 %v7176_v26  ;;  %5160 = vmatprep.mubr.f32.mxu0 %v5090_v33  ;;  %v6162_v26 = vld [vmem:[%s9318_s3 + $0x5e0] sm:$0xff]  ;;  %v6202_v33 = vld [vmem:[%s9318_s3 + $0x718] sm:$0xff]  ;;  %v7251_v23 = vpack.c.bf16 %v6208_v13, %v6207_v20 }
 0x262   : > { %7179 = vmatprep.subr.bf16.mxu0 %v7178_v30  ;;  %v6184_v30 = vld [vmem:[%s9318_s3 + $0x688] sm:$0xff]  ;;  %v6220_v19 = vld [vmem:[%s9318_s3 + $0x7a0] sm:$0xff] }
 0x263   : > { %7217 = vmatpush3.bf16.msra.mxu1 %v7216_v34  ;;  %v7198_v34 = vpack.c.bf16 %v6163_v27, %v6162_v26  ;;  %v5278_v26 = vrot.slane %v8446_v54, 5  ;;  %v6209_v27 = vld [vmem:[%s9318_s3 + $0x750] sm:$0xff]  ;;  %v6257_v13 = vld [vmem:[%s9318_s3 + $0x8c0] sm:$0xff] }
 0x264   : > { %7219 = vmatprep.subr.bf16.mxu1 %v7218_v40  ;;  %v7236_v40 = vpack.c.bf16 %v6184_v30, %v6183_v29 }
 0x265   : > { %7181 = vmatpush3.bf16.msra.mxu0 %v7180_v36  ;;  %v7238_v36 = vpack.c.bf16 %v6202_v33, %v6201_v32  ;;  %v6223_v32 = vld [vmem:[%s9318_s3 + $0x7b8] sm:$0xff] }
 0x266   : > { %6928 = vmatmul.mubr.msk.f32.vlgmr.msra.gmra.mrb[52].mxu1 %vm3318_vm5, %v5091_v50  ;;  %7183 = vmatprep.subr.bf16.mxu0 %v7182_v45  ;;  %v7200_v45 = vpack.c.bf16 %v6147_v37, %v6146_v35  ;;  %v7240_v50 = vpack.c.bf16 %v6186_v44, %v6185_v43  ;;  %v6241_v35 = vld [vmem:[%s9318_s3 + $0x848] sm:$0xff]  ;;  %v6211_v37 = vld [vmem:[%s9318_s3 + $0x760] sm:$0xff] }
 0x267   : > { %7221 = vmatpush3.bf16.msra.mxu1 %v7220_v47  ;;  %5349 = vmatprep.mubr.f32.mxu1 %v5279_v56  ;;  %v7202_v47 = vpack.c.bf16 %v6165_v42, %v6164_v41  ;;  %v6187_v56 = vld [vmem:[%s9318_s3 + $0x6a0] sm:$0xff]  ;;  %v6225_v43 = vld [vmem:[%s9318_s3 + $0x7c8] sm:$0xff] }
 0x268   : > { %7223 = vmatprep.subr.bf16.mxu1 %v7222_v51  ;;  %v6232_v51 = vld [vmem:[%s9318_s3 + $0x800] sm:$0xff] }
 0x269   : > { %7185 = vmatpush3.bf16.msra.mxu0 %v7184_v57  ;;  %v6188_v57 = vld [vmem:[%s9318_s3 + $0x6a8] sm:$0xff]  ;;  %v7262_v61 = vpack.c.bf16 %v6233_v53, %v6232_v51  ;;  %v6227_v51 = vld [vmem:[%s9318_s3 + $0x7d8] sm:$0xff] }
 0x26a   : > { %7187 = vmatprep.subr.bf16.mxu0 %v7186_v60  ;;  %v6206_v60 = vld [vmem:[%s9318_s3 + $0x738] sm:$0xff]  ;;  %v7244_v2 = vpack.c.bf16 %v6188_v57, %v6187_v56  ;;  %v6245_v56 = vld [vmem:[%s9318_s3 + $0x868] sm:$0xff]  ;;  %v6248_v57 = vld [vmem:[%s9318_s3 + $0x880] sm:$0xff] }
 0x26b   : > { %7225 = vmatpush3.bf16.msra.mxu1 %v7224_v63  ;;  %v6217_v63 = vld [vmem:[%s9318_s3 + $0x788] sm:$0xff]  ;;  %v7246_v7 = vpack.c.bf16 %v6206_v60, %v6205_v59 }
 0x26c   : > { %7227 = vmatprep.subr.bf16.mxu1 %v7226_v6  ;;  %v6235_v6 = vld [vmem:[%s9318_s3 + $0x818] sm:$0xff]  ;;  %v7264_v12 = vpack.c.bf16 %v6217_v63, %v6216_v62  ;;  %v6229_v62 = vld [vmem:[%s9318_s3 + $0x7e8] sm:$0xff] }
 0x26d   : > { %7189 = vmatpush3.bf16.msra.mxu0 %v7188_v10  ;;  %v6190_v10 = vld [vmem:[%s9318_s3 + $0x6b8] sm:$0xff] }
 0x26e   : > { %7191 = vmatprep.subr.bf16.mxu0 %v7190_v15  ;;  %v7266_v15 = vpack.c.bf16 %v6235_v6, %v6234_v5  ;;  %v7248_v8 = vpack.c.bf16 %v6190_v10, %v6189_v9  ;;  %v6247_v5 = vld [vmem:[%s9318_s3 + $0x878] sm:$0xff]  ;;  %v5280_v6 = vrot.slane %v8346_v1, 5 }
 0x26f   : > { %7229 = vmatpush3.bf16.msra.mxu1 %v7228_v3  ;;  %v5468_v3 = vrot.slane %v8444_v52, 6  ;;  %v6251_v9 = vld [vmem:[%s9318_s3 + $0x898] sm:$0xff] }
 0x270   : > { %7231 = vmatprep.subr.bf16.mxu1 %v7230_v11  ;;  %v6237_v11 = vld [vmem:[%s9318_s3 + $0x828] sm:$0xff] }
 0x271   : > { %7193 = vmatpush3.bf16.msra.mxu0 %v7192_v21  ;;  %v7268_v21 = vpack.c.bf16 %v6219_v16, %v6218_v4  ;;  %v7270_v18 = vpack.c.bf16 %v6237_v11, %v6236_v17  ;;  %v6273_v16 = vld [vmem:[%s9318_s3 + $0x940] sm:$0xff]  ;;  %v6253_v17 = vld [vmem:[%s9318_s3 + $0x8a8] sm:$0xff] }
 0x272   : > { %7195 = vmatprep.subr.bf16.mxu0 %v7194_v22  ;;  %v6221_v22 = vld [vmem:[%s9318_s3 + $0x7a8] sm:$0xff] }
 0x273   : > { %7233 = vmatpush3.bf16.msra.mxu1 %v7232_v24  ;;  %v6239_v24 = vld [vmem:[%s9318_s3 + $0x838] sm:$0xff]  ;;  %v7272_v29 = vpack.c.bf16 %v6221_v22, %v6220_v19  ;;  %v6275_v19 = vld [vmem:[%s9318_s3 + $0x950] sm:$0xff] }
 0x274   : > { %7235 = vmatprep.subr.bf16.mxu1 %v7234_v28  ;;  %v6210_v28 = vld [vmem:[%s9318_s3 + $0x758] sm:$0xff]  ;;  %v7274_v30 = vpack.c.bf16 %v6239_v24, %v6238_v25 }
 0x275   : > { %7197 = vmatpush3.bf16.msra.mxu0 %v7196_v31  ;;  %v6222_v31 = vld [vmem:[%s9318_s3 + $0x7b0] sm:$0xff]  ;;  %v7254_v33 = vpack.c.bf16 %v6210_v28, %v6209_v27  ;;  %v6276_v22 = vld [vmem:[%s9318_s3 + $0x958] sm:$0xff] }
 0x276   : > { %7199 = vmatprep.subr.bf16.mxu0 %v7198_v34  ;;  %v6240_v34 = vld [vmem:[%s9318_s3 + $0x840] sm:$0xff]  ;;  %v7276_v41 = vpack.c.bf16 %v6223_v32, %v6222_v31  ;;  %v6255_v25 = vld [vmem:[%s9318_s3 + $0x8b8] sm:$0xff]  ;;  %v7310_v27 = vpack.c.bf16 %v6276_v22, %v6275_v19  ;;  %v6259_v28 = vld [vmem:[%s9318_s3 + $0x8d0] sm:$0xff] }
 0x277   : > { %7237 = vmatpush3.bf16.msra.mxu1 %v7236_v40  ;;  %v6212_v40 = vld [vmem:[%s9318_s3 + $0x768] sm:$0xff]  ;;  %v7278_v42 = vpack.c.bf16 %v6241_v35, %v6240_v34  ;;  %v6277_v32 = vld [vmem:[%s9318_s3 + $0x960] sm:$0xff]  ;;  %v6272_v19 = vld [vmem:[%s9318_s3 + $0x938] sm:$0xff] }
 0x278   : > { %7239 = vmatprep.subr.bf16.mxu1 %v7238_v36  ;;  %v6224_v36 = vld [vmem:[%s9318_s3 + $0x7c0] sm:$0xff]  ;;  %v7257_v44 = vpack.c.bf16 %v6212_v40, %v6211_v37 }
 0x279   : > { %7201 = vmatpush3.bf16.msra.mxu0 %v7200_v45  ;;  %v6242_v45 = vld [vmem:[%s9318_s3 + $0x850] sm:$0xff]  ;;  %v7280_v48 = vpack.c.bf16 %v6225_v43, %v6224_v36  ;;  %v6289_v34 = vld [vmem:[%s9318_s3 + $0x9c0] sm:$0xff]  ;;  %v6280_v43 = vld [vmem:[%s9318_s3 + $0x978] sm:$0xff] }
 0x27a   : > { %7203 = vmatprep.subr.bf16.mxu0 %v7202_v47  ;;  %v6214_v47 = vld [vmem:[%s9318_s3 + $0x778] sm:$0xff]  ;;  %v7282_v49 = vpack.c.bf16 %v6243_v39, %v6242_v45  ;;  %v6261_v40 = vld [vmem:[%s9318_s3 + $0x8e0] sm:$0xff]  ;;  %v6279_v36 = vld [vmem:[%s9318_s3 + $0x970] sm:$0xff] }
 0x27b   : > { %7241 = vmatpush3.bf16.msra.mxu1 %v7240_v50  ;;  %v6226_v50 = vld [vmem:[%s9318_s3 + $0x7d0] sm:$0xff]  ;;  %v7260_v53 = vpack.c.bf16 %v6214_v47, %v6213_v46  ;;  %v6292_v39 = vld [vmem:[%s9318_s3 + $0x9d8] sm:$0xff]  ;;  %v7318_v47 = vpack.c.bf16 %v6280_v43, %v6279_v36 }
 0x27c   : > { %7243 = vmatprep.subr.bf16.mxu1 %v7242_v55  ;;  %v6244_v55 = vld [vmem:[%s9318_s3 + $0x860] sm:$0xff]  ;;  %v7284_v59 = vpack.c.bf16 %v6227_v51, %v6226_v50  ;;  %v6291_v45 = vld [vmem:[%s9318_s3 + $0x9d0] sm:$0xff] }
 0x27d   : > { %7205 = vmatpush3.bf16.msra.mxu0 %v7204_v58  ;;  %v6249_v58 = vld [vmem:[%s9318_s3 + $0x888] sm:$0xff]  ;;  %v7286_v60 = vpack.c.bf16 %v6245_v56, %v6244_v55  ;;  %v7342_v50 = vpack.c.bf16 %v6292_v39, %v6291_v45  ;;  %v6281_v51 = vld [vmem:[%s9318_s3 + $0x980] sm:$0xff] }
 0x27e   : > { %7263 = vmatprep.subr.bf16.mxu0 %v7262_v61  ;;  %v6228_v61 = vld [vmem:[%s9318_s3 + $0x7e0] sm:$0xff]  ;;  %v7295_v63 = vpack.c.bf16 %v6249_v58, %v6248_v57  ;;  %v6294_v56 = vld [vmem:[%s9318_s3 + $0x9e8] sm:$0xff] }
 0x27f   : > { %7245 = vmatpush3.bf16.msra.mxu1 %v7244_v2  ;;  %v6246_v2 = vld [vmem:[%s9318_s3 + $0x870] sm:$0xff]  ;;  %v7288_v10 = vpack.c.bf16 %v6229_v62, %v6228_v61  ;;  %v6293_v55 = vld [vmem:[%s9318_s3 + $0x9e0] sm:$0xff] }
 0x280   : > { %5161 = vmatmul.mubr.f32.vlgmr.msra.gmra.mrb[8].mxu0 %v5089_v14  ;;  %7247 = vmatprep.subr.bf16.mxu1 %v7246_v7  ;;  %v6250_v7 = vld [vmem:[%s9318_s3 + $0x890] sm:$0xff]  ;;  %v7345_v61 = vpack.c.bf16 %v6294_v56, %v6293_v55 }
 0x281   : > { %7265 = vmatpush3.bf16.msra.mxu0 %v7264_v12  ;;  %5538 = vmatprep.mubr.f32.mxu0 %v5468_v3  ;;  %v7290_v12 = vpack.c.bf16 %v6247_v5, %v6246_v2  ;;  %v6230_v14 = vld [vmem:[%s9318_s3 + $0x7f0] sm:$0xff]  ;;  %v7298_v4 = vpack.c.bf16 %v6251_v9, %v6250_v7  ;;  %v6274_v3 = vld [vmem:[%s9318_s3 + $0x948] sm:$0xff]  ;;  %v6296_v5 = vld [vmem:[%s9318_s3 + $0x9f8] sm:$0xff] }
 0x282   : > { %7267 = vmatprep.subr.bf16.mxu0 %v7266_v15  ;;  %v6231_v15 = vld [vmem:[%s9318_s3 + $0x7f8] sm:$0xff]  ;;  %v7306_v20 = vpack.c.bf16 %v6274_v3, %v6273_v16  ;;  %v6283_v62 = vld [vmem:[%s9318_s3 + $0x990] sm:$0xff]  ;;  %v6269_v3 = vld [vmem:[%s9318_s3 + $0x920] sm:$0xff] }
 0x283   : > { %7249 = vmatpush3.bf16.msra.mxu1 %v7248_v8  ;;  %v6252_v8 = vld [vmem:[%s9318_s3 + $0x8a0] sm:$0xff]  ;;  %v7292_v11 = vpack.c.bf16 %v6231_v15, %v6230_v14  ;;  %v6295_v2 = vld [vmem:[%s9318_s3 + $0x9f0] sm:$0xff]  ;;  %v6286_v15 = vld [vmem:[%s9318_s3 + $0x9a8] sm:$0xff] }
 0x284   : > { %7250 = vmatprep.subr.bf16.mxu1 %v7587_v38  ;;  %v6267_v9 = vld [vmem:[%s9318_s3 + $0x910] sm:$0xff]  ;;  %v6285_v14 = vld [vmem:[%s9318_s3 + $0x9a0] sm:$0xff] }
 0x285   : > { %7269 = vmatpush3.bf16.msra.mxu0 %v7268_v21  ;;  %v6258_v21 = vld [vmem:[%s9318_s3 + $0x8c8] sm:$0xff]  ;;  %v7330_v16 = vpack.c.bf16 %v6286_v15, %v6285_v14 }
 0x286   : > { %5350 = vmatmul.mubr.f32.vlgmr.msra.gmra.mrb[56].mxu1 %v5278_v26  ;;  %7271 = vmatprep.subr.bf16.mxu0 %v7270_v18  ;;  %v7301_v18 = vpack.c.bf16 %v6253_v17, %v6252_v8  ;;  %v7308_v24 = vpack.c.bf16 %v6258_v21, %v6257_v13  ;;  %v5467_v26 = vrot.slane %v8446_v54, 6  ;;  %v6270_v8 = vld [vmem:[%s9318_s3 + $0x928] sm:$0xff]  ;;  %v6287_v17 = vld [vmem:[%s9318_s3 + $0x9b0] sm:$0xff] }
 0x287   : > { %7252 = vmatpush3.bf16.msra.mxu1 %v7251_v23  ;;  %6946 = vmatprep.mubr.msk.f32.mxu1 %vm7586_vm11, %v7560_v0  ;;  %v6254_v23 = vld [vmem:[%s9318_s3 + $0x8b0] sm:$0xff]  ;;  %v7332_v13 = vpack.c.bf16 %v6270_v8, %v6269_v3 }
 0x288   : > { %7253 = vmatprep.subr.bf16.mxu1 %v7587_v38  ;;  %v7304_v31 = vpack.c.bf16 %v6255_v25, %v6254_v23 }
 0x289   : > { %7273 = vmatpush3.bf16.msra.mxu0 %v7272_v29  ;;  %v6260_v29 = vld [vmem:[%s9318_s3 + $0x8d8] sm:$0xff] }
 0x28a   : > { %7275 = vmatprep.subr.bf16.mxu0 %v7274_v30  ;;  %v5657_v30 = vrot.slane %v8444_v52, 7  ;;  %v6290_v52 = vld [vmem:[%s9318_s3 + $0x9c8] sm:$0xff]  ;;  %v7312_v35 = vpack.c.bf16 %v6260_v29, %v6259_v28 }
 0x28b   : > { %7255 = vmatpush3.bf16.msra.mxu1 %v7254_v33  ;;  %v6278_v33 = vld [vmem:[%s9318_s3 + $0x968] sm:$0xff] }
 0x28c   : > { %7256 = vmatprep.subr.bf16.mxu1 %v7587_v38  ;;  %v7314_v37 = vpack.c.bf16 %v6278_v33, %v6277_v32 }
 0x28d   : > { %7277 = vmatpush3.bf16.msra.mxu0 %v7276_v41  ;;  %v6262_v41 = vld [vmem:[%s9318_s3 + $0x8e8] sm:$0xff] }
 0x28e   : > { %7279 = vmatprep.subr.bf16.mxu0 %v7278_v42  ;;  %v7339_v42 = vpack.c.bf16 %v6290_v52, %v6289_v34  ;;  %v7316_v46 = vpack.c.bf16 %v6262_v41, %v6261_v40  ;;  %v5805_v34 = vld [vmem:[%s9320_s5] sm:$0xff]  ;;  %v5808_v40 = vld [vmem:[%s9320_s5 + $0x18] sm:$0xff] }
 0x28f   : > { %7258 = vmatpush3.bf16.msra.mxu1 %v7257_v44  ;;  %v5469_v44 = vrot.slane %v8346_v1, 6 }
 0x290   : > { %7259 = vmatprep.subr.bf16.mxu1 %v7587_v38 }
 0x291   : > { %7281 = vmatpush3.bf16.msra.mxu0 %v7280_v48  ;;  %v6263_v48 = vld [vmem:[%s9318_s3 + $0x8f0] sm:$0xff] }
 0x292   : > { %7283 = vmatprep.subr.bf16.mxu0 %v7282_v49  ;;  %v6264_v49 = vld [vmem:[%s9318_s3 + $0x8f8] sm:$0xff] }
 0x293   : > { %7261 = vmatpush3.bf16.msra.mxu1 %v7260_v53  ;;  %v6282_v53 = vld [vmem:[%s9318_s3 + $0x988] sm:$0xff]  ;;  %v7320_v57 = vpack.c.bf16 %v6264_v49, %v6263_v48 }
 0x294   : > { %7294 = vmatprep.subr.bf16.mxu1 %v7587_v38  ;;  %v7322_v58 = vpack.c.bf16 %v6282_v53, %v6281_v51 }
 0x295   : > { %7285 = vmatpush3.bf16.msra.mxu0 %v7284_v59  ;;  %v6265_v59 = vld [vmem:[%s9318_s3 + $0x900] sm:$0xff] }
 0x296   : > { %6947 = vmatmul.mubr.msk.f32.vlgmr.msra.gmra.mrb[52].mxu1 %vm3318_vm5, %v5280_v6  ;;  %7287 = vmatprep.subr.bf16.mxu0 %v7286_v60  ;;  %v6266_v60 = vld [vmem:[%s9318_s3 + $0x908] sm:$0xff] }
 0x297   : > { %7296 = vmatpush3.bf16.msra.mxu1 %v7295_v63  ;;  %6965 = vmatprep.mubr.msk.f32.mxu1 %vm7586_vm11, %v7560_v0  ;;  %v6284_v63 = vld [vmem:[%s9318_s3 + $0x998] sm:$0xff]  ;;  %v7324_v6 = vpack.c.bf16 %v6266_v60, %v6265_v59 }
 0x298   : > { %7297 = vmatprep.subr.bf16.mxu1 %v7587_v38  ;;  %v7326_v7 = vpack.c.bf16 %v6284_v63, %v6283_v62 }
 0x299   : > { %7289 = vmatpush3.bf16.msra.mxu0 %v7288_v10  ;;  %v6268_v10 = vld [vmem:[%s9318_s3 + $0x918] sm:$0xff] }
 0x29a   : > { %7291 = vmatprep.subr.bf16.mxu0 %v7290_v12  ;;  %v7348_v12 = vpack.c.bf16 %v6296_v5, %v6295_v2  ;;  %v5809_v5 = vld [vmem:[%s9321_s6] sm:$0x1] }
 0x29b   : > { %7299 = vmatpush3.bf16.msra.mxu1 %v7298_v4  ;;  %v7328_v4 = vpack.c.bf16 %v6268_v10, %v6267_v9 }
 0x29c   : > { %7300 = vmatprep.subr.bf16.mxu1 %v7587_v38 }
 0x29d   : > { %7293 = vmatpush3.bf16.msra.mxu0 %v7292_v11  ;;  %v6288_v11 = vld [vmem:[%s9318_s3 + $0x9b8] sm:$0xff] }
 0x29e   : > { %7307 = vmatprep.subr.bf16.mxu0 %v7306_v20  ;;  %v5658_v20 = vrot.slane %v8346_v1, 7  ;;  %v7334_v21 = vpack.c.bf16 %v6288_v11, %v6287_v17  ;;  %v5656_v1 = vrot.slane %v8446_v54, 7 }
 0x29f   : > { %7302 = vmatpush3.bf16.msra.mxu1 %v7301_v18  ;;  %v6271_v18 = vld [vmem:[%s9318_s3 + $0x930] sm:$0xff] }
 0x2a0   : > { %5539 = vmatmul.mubr.f32.vlgmr.msra.gmra.mrb[10].mxu0 %v5467_v26  ;;  %7303 = vmatprep.subr.bf16.mxu1 %v7587_v38  ;;  %v7336_v22 = vpack.c.bf16 %v6272_v19, %v6271_v18  ;;  %v4294_v26 = vld [vmem:[%s9319_s4] sm:$0x1] }
 0x2a1   : > { %7309 = vmatpush3.bf16.msra.mxu0 %v7308_v24  ;;  %5727 = vmatprep.mubr.f32.mxu0 %v5657_v30 }
 0x2a2   : > { %7311 = vmatprep.subr.bf16.mxu0 %v7310_v27 }
 0x2a3   : > { %7305 = vmatpush3.bf16.msra.mxu1 %v7304_v31 }
 0x2a4   : > { %7338 = vmatprep.subr.bf16.mxu1 %v7587_v38 }
 0x2a5   : > { %7313 = vmatpush3.bf16.msra.mxu0 %v7312_v35 }
 0x2a6   : > { %6966 = vmatmul.mubr.msk.f32.vlgmr.msra.gmra.mrb[52].mxu1 %vm3318_vm5, %v5469_v44  ;;  %7315 = vmatprep.subr.bf16.mxu0 %v7314_v37  ;;  %v5807_v37 = vld [vmem:[%s9320_s5 + $0x10] sm:$0xff] }
 0x2a7   : > { %7340 = vmatpush3.bf16.msra.mxu1 %v7339_v42  ;;  %6984 = vmatprep.mubr.msk.f32.mxu1 %vm7586_vm11, %v7560_v0  ;;  %v7354_v41 = vpack.c.bf16 %v5808_v40, %v5807_v37 }
 0x2a8   : > { %7341 = vmatprep.subr.bf16.mxu1 %v7587_v38 }
 0x2a9   : > { %7317 = vmatpush3.bf16.msra.mxu0 %v7316_v46 }
 0x2aa   : > { %7319 = vmatprep.subr.bf16.mxu0 %v7318_v47 }
 0x2ab   : > { %7343 = vmatpush3.bf16.msra.mxu1 %v7342_v50 }
 0x2ac   : > { %7344 = vmatprep.subr.bf16.mxu1 %v7587_v38 }
 0x2ad   : > { %7321 = vmatpush3.bf16.msra.mxu0 %v7320_v57 }
 0x2ae   : > { %7323 = vmatprep.subr.bf16.mxu0 %v7322_v58 }
 0x2af   : > { %7346 = vmatpush3.bf16.msra.mxu1 %v7345_v61 }
 0x2b0   : > { %7347 = vmatprep.subr.bf16.mxu1 %v7587_v38 }
 0x2b1   : > { %7325 = vmatpush3.bf16.msra.mxu0 %v7324_v6 }
 0x2b2   : > { %7327 = vmatprep.subr.bf16.mxu0 %v7326_v7 }
 0x2b3   : > { %7349 = vmatpush3.bf16.msra.mxu1 %v7348_v12 }
 0x2b5   : > { %7329 = vmatpush3.bf16.msra.mxu0 %v7328_v4 }
 0x2b6   : > { %6985 = vmatmul.mubr.msk.f32.vlgmr.msra.gmra.mrb[52].mxu1 %vm3318_vm5, %v5658_v20  ;;  %7331 = vmatprep.subr.bf16.mxu0 %v7330_v16 }
 0x2b9   : > { %7333 = vmatpush3.bf16.msra.mxu0 %v7332_v13 }
 0x2ba   : > { %7335 = vmatprep.subr.bf16.mxu0 %v7334_v21 }
 0x2bd   : > { %7337 = vmatpush3.bf16.msra.mxu0 %v7336_v22 }
 0x2be   : > { %7350 = vmatprep.subr.bf16.mxu0 %v7587_v38 }
 0x2c0   : > { %5728 = vmatmul.mubr.f32.vlgmr.msra.gmra.mrb[12].mxu0 %v5656_v1 }
 0x2c1   : > { %6995 = vmatprep.mubr.msk.f32.mxu0 %vm7586_vm11, %v7560_v0  ;;  %v5806_v0 = vld [vmem:[%s9320_s5 + $0x8] sm:$0xff]  ;;  %vm5884_vm11 = vcmask 73728  }
 0x2c2   : > { %v7351_v35 = vpack.c.bf16 %v5806_v0, %v5805_v34 }
 0x2c4   : > { %7352 = vmatpush3.bf16.msra.mxu0 %v7351_v35 }
 0x2c5   : > { %7353 = vmatprep.subr.bf16.mxu0 %v7587_v38 }
 0x2c8   : > { %7355 = vmatpush3.bf16.msra.mxu0 %v7354_v41 }
 0x2f3   : > { %v6385_v23 = vpop.f32.mrb[2].mxu0 }
 0x2f4   : > { %v6386_v25 = vpop.f32.mrb[3].mxu0 }
 0x2f5   : > { %v6387_v24 = vadd.f32 %v6386_v25, %v6385_v23 }
 0x2f7   : > { %v7358_v29 = vadd.f32 %v6387_v24, %v4294_v26 }
 0x2f9   : > { %v6429_v27 = vpop.f32.mrb[54].mxu1 }
 0x2fa   : > { %v6430_v28 = vpop.f32.mrb[55].mxu1 }
 0x2fb   : > { %v6431_v30 = vadd.f32 %v6430_v28, %v6429_v27 }
 0x2fd   : > { %v7359_v31 = vadd.f32 %v7358_v29, %v6431_v30 }
 0x313   : > { %v6473_v32 = vpop.f32.mrb[4].mxu0 }
 0x314   : > { %v6474_v54 = vpop.f32.mrb[5].mxu0 }
 0x315   : > { %v6475_v33 = vadd.f32 %v6474_v54, %v6473_v32 }
 0x317   : > { %v7360_v52 = vadd.f32 %v7359_v31, %v6475_v33 }
 0x333   : > { %v6517_v42 = vpop.f32.mrb[6].mxu0 }
 0x334   : > { %v6518_v36 = vpop.f32.mrb[7].mxu0 }
 0x335   : > { %v6519_v43 = vadd.f32 %v6518_v36, %v6517_v42 }
 0x337   : > { %v7361_v44 = vadd.f32 %v7360_v52, %v6519_v43 }
 0x353   : > { %v6561_v45 = vpop.f32.mrb[8].mxu0 }
 0x354   : > { %v6562_v39 = vpop.f32.mrb[9].mxu0 }
 0x355   : > { %v6563_v46 = vadd.f32 %v6562_v39, %v6561_v45 }
 0x357   : > { %v7362_v47 = vadd.f32 %v7361_v44, %v6563_v46 }
 0x359   : > { %v6605_v48 = vpop.f32.mrb[56].mxu1 }
 0x35a   : > { %v6606_v38 = vpop.f32.mrb[57].mxu1 }
 0x35b   : > { %v6607_v49 = vadd.f32 %v6606_v38, %v6605_v48 }
 0x35d   : > { %v7363_v50 = vadd.f32 %v7362_v47, %v6607_v49 }
 0x373   : > { %v6649_v51 = vpop.f32.mrb[10].mxu0 }
 0x374   : > { %v6650_v53 = vpop.f32.mrb[11].mxu0 }
 0x375   : > { %v6651_v55 = vadd.f32 %v6650_v53, %v6649_v51 }
 0x377   : > { %v7364_v56 = vadd.f32 %v7363_v50, %v6651_v55 }
 0x389   : > { %v5799_v57 = vpop.f32.mrb[52].mxu1 }
 0x38a   : > { %v6986_v58 = vpop.f32.mrb[53].mxu1 }
 0x393   : > { %v6693_v59 = vpop.f32.mrb[12].mxu0 }
 0x394   : > { %v6694_v60 = vpop.f32.mrb[13].mxu0 }
 0x395   : > { %v6695_v61 = vadd.f32 %v6694_v60, %v6693_v59 }
 0x397   : > { %v7365_v62 = vadd.f32 %v7364_v56, %v6695_v61 }
 0x399   : > { %v7366_v63 = vadd.f32 %v7365_v62, %v5799_v57 }
 0x39b   : > { %v5804_v2 = vmax.f32 %v7366_v63, 0.0 }
 0x39d   : > { %6996 = vmatmul.mubr.msk.f32.vlgmr.msra.gmra.mrb[14].mxu0 %vm5810_vm0, %v5804_v2 }
 0x470   : > { %v5880_v6 = vpop.f32.mrb[14].mxu0 }
 0x471   : > { %v5881_v7 = vadd.f32 %v5880_v6, %v5809_v5  ;;  %v6997_v9 = vpop.f32.mrb[15].mxu0 }
 0x473   : > { %5885 = vst.msk [vmem:[%s270_s21] sm:$0x1] %vm5884_vm11, %v5881_v7 }
 0x474   : > { %7509 = shalt.err (!%p7506_p3)
}
 0x475   : > { %s7510_s17 = scalar_lea.hbm %s9273_s8, 16  ;;  %s7514_s19 = scalar_lea.hbm %s9322_s7, 32 }
 0x476   : > { %p7511_p4 = scmp.ne.s32.totalorder %s9273_s8, %s7510_s17  ;;  %p7515_p9 = scmp.lt.u32.totalorder %s9273_s8, %s9322_s7 }
 0x477   : > { %p7516_p10 = scmp.lt.u32.totalorder %s7514_s19, %s7510_s17  ;;  %p7518_p12 = scmp.lt.u32.totalorder %s7510_s17, %s9273_s8 }
 0x478   : > { %p7512_p7 = pnand %p7511_p4, %p7667_p5 }
 0x479   : > { %p7517_p11 = por %p7516_p10, %p7515_p9 }
 0x47a   : > { %p7513_p8 = pneg %p7512_p7 }
 0x47b   : > { %p7519_p13 = por %p7518_p12, %p7517_p11 }
 0x47d   : > { %p7520_p0 = pnand %p7519_p13, %p7513_p8 }
 0x47f   : > { %7523 = shalt.err (!%p7520_p0)
}
 0x480   : > { %7427 = dma.vmem_to_hbm [thread:$0]  (%p7667_p5), %s9275_s22, 16, %s9273_s8, %s5887_s9  }
 0x481 PF: > { %p7433_p1 = scmp.ge.s32.totalorder %s7558_s27, 2  ;;  %s5911_s23 = sand.u32 1, %s7546_s24  }
 0x482   : > { %s5912_s29 = scalar_lea.sflag [#allocation3], %s5911_s23 }
 0x483   : > { %p7430_p2 = pnand %p7433_p1, %p7671_p6 }
 0x485   : > { %7541 = dma.done.wait (!%p7430_p2), %s5912_s29, 16  }
 0x486   : > { %7543 = vsyncadd (!%p7430_p2), %s5912_s29, 4294967280  ;;  %p17_p3 = scmp.ge.s32.totalorder %s7654_s30, 4   ;;  %s9325_s24 = smov %s7550_s25 }
 0x487   : > { %s9326_s25 = smov %s7554_s26  ;;  %s9327_s26 = smov %s7665_s10 }
 0x488   : > { %s9328_s27 = smov %s7654_s30  ;;  %19 = sbr.rel (!%p17_p3) target bundleno = 3 (0x3), region = 90 }
 0x48f   :  { %5916 = vsyncpa [#allocation3], 1 }
 0x490   :  { %5918 = vsyncpa [#allocation3 + $0x1], 1 }

</bundles_post_ra>
